<compile_context>
chip_gen: v5e
topology: v5e:2x2
jax: 0.10.0
libtpu: 0.0.40
codegen_flags: <defaults>
</compile_context>

<pallas_src>
import math
import numpy as np
import jax
import jax.numpy as jnp
from jax.experimental import pallas as pl
from jax.experimental.pallas import tpu as pltpu

# ------------------------ simulation / neuron config -------------------------
TS = 1.0            # netParams['simulation']['Ts']
T_SAMPLE = 8        # netParams['simulation']['tSample'] -> T = 8 time bins
THETA = (30.0, 50.0, 100.0)
TAU_SR = (1.0, 2.0, 4.0)
TAU_REF = (1.0, 2.0, 4.0)
SCALE_REF = (1.0, 1.0, 1.0)
# tauRho / scaleRho only shape the surrogate gradient (backward) -> not needed here.

COMPUTE_DTYPE = jnp.bfloat16    # matmul operand dtype (accumulation stays f32)
K_ALIGN = 16                    # contraction-dim alignment (bf16 sublane tile)


def alpha_kernel(tau, mult, t_sample=T_SAMPLE, ts=TS, eps=0.01):
    """slayerSNN _calculateAlphaKernel: mult * t/tau * exp(1 - t/tau)."""
    vals = []
    for t in np.arange(0.0, t_sample, ts):
        v = mult * t / tau * math.exp(1.0 - t / tau)
        if abs(v) < eps and t > tau:
            break
        vals.append(v)
    return np.asarray(vals, dtype=np.float32)


def srm_kernel(i):
    return alpha_kernel(TAU_SR[i], 1.0, eps=0.01)


def ref_kernel(i):
    return alpha_kernel(TAU_REF[i], -SCALE_REF[i] * THETA[i], eps=0.0001)


def psp_matrix(srm_k, T):
    """M[t, t'] = Ts * srm_k[t - t'] (causal): psp(x)[t] = sum_{t'} M[t, t'] x[t']."""
    M = np.zeros((T, T), np.float32)
    for t in range(T):
        for d in range(len(srm_k)):
            if t - d >= 0:
                M[t, t - d] = TS * srm_k[d]
    return M


def bilinear_phase_taps():
    """x2 bilinear (align_corners=False) as per-phase 3-tap filters over offsets
    (-1, 0, +1) on an EDGE-replicated input (edge replication == torch border clamp)."""
    return np.array([[0.25, 0.75, 0.00],    # even output row 2y   : 0.25*x[y-1] + 0.75*x[y]
                     [0.00, 0.75, 0.25]],   # odd  output row 2y+1 : 0.75*x[y]   + 0.25*x[y+1]
                    np.float32)


def residual_block(C):
    """(C*4, C*9) depthwise bilinear operator: rows (c, dy, dx), cols (ci, ey, ex)."""
    taps = bilinear_phase_taps()
    Bm = np.zeros((C * 4, C * 9), np.float32)
    for c in range(C):
        for dy in range(2):
            for dx in range(2):
                r = c * 4 + dy * 2 + dx
                for ey in range(3):
                    for ex in range(3):
                        Bm[r, c * 9 + ey * 3 + ex] = taps[dy, ey] * taps[dx, ex]
    return Bm


# ------------------------------ kernel helpers --------------------------------
def _as_pyfloats(M):
    M = np.asarray(M)
    return [[float(v) for v in row] for row in M]


def _psp_mix(coeff_sets, T):
    """v[t] = sum over (M, blocks) sets of sum_{t'} M[t][t'] * blocks[t'].
    M entries are Python floats (baked at trace time); zero coefficients are skipped,
    so only the causal lower-triangular terms are emitted (~T^2/2 vreg FMAs)."""
    out = []
    for t in range(T):
        acc = None
        for M, blocks in coeff_sets:
            for tp in range(T):
                c = M[t][tp]
                if c == 0.0:
                    continue
                term = blocks[tp] if c == 1.0 else c * blocks[tp]
                acc = term if acc is None else acc + term
        if acc is None:
            acc = jnp.zeros_like(coeff_sets[0][1][0])
        out.append(acc)
    return out


def _spike_scan(v, theta, ref_vals, store_fn, T):
    """Sequential threshold + additive refractory scan over per-time (C, S) blocks."""
    amp = 1.0 / TS
    for t in range(T):
        fired = (v[t] >= theta).astype(jnp.float32)          # 0/1 spike indicator
        store_fn(t, fired if amp == 1.0 else fired * amp)     # skip mul when amp == 1
        for j in range(1, len(ref_vals)):                     # refractory on future u
            rv = ref_vals[j]
            if rv != 0.0 and t + j < T:
                v[t + j] = v[t + j] + rv * fired


def make_layer1_kernel(T, S, M1, theta, ref_vals):
    """spike1( psp1( conv1(x) ) ): spatial matmul -> T-mix -> spike scan."""
    M1c = _as_pyfloats(M1)
    refs = [float(r) for r in ref_vals]
    theta = float(theta)

    def kernel(w_ref, x_ref, o_ref):
        u = jnp.dot(w_ref[...], x_ref[...], preferred_element_type=jnp.float32)
        ub = [u[:, t * S:(t + 1) * S] for t in range(T)]
        v = _psp_mix([(M1c, ub)], T)

        def store(t, s):
            o_ref[:, t * S:(t + 1) * S] = s.astype(o_ref.dtype)

        _spike_scan(v, theta, refs, store, T)

    return kernel


def make_layer23_kernel(T, S, M1, M2, M3, theta2, ref2, theta3, ref3):
    """Fused layers 2+3:
       s2 = spike2( psp2( conv2(s1) ) )            (s2 kept in VMEM scratch)
       s3 = spike3( psp3( upconv(s2) ) + bilinear_x2( psp1(x) ) )"""
    M1c, M2c, M3c = _as_pyfloats(M1), _as_pyfloats(M2), _as_pyfloats(M3)
    ref2c = [float(r) for r in ref2]
    ref3c = [float(r) for r in ref3]
    theta2, theta3 = float(theta2), float(theta3)

    def kernel(w2_ref, x2_ref, wup_ref, wr_ref, xr_ref, o_ref, s2_ref):
        # ---------------- layer 2 ----------------
        u2 = jnp.dot(w2_ref[...], x2_ref[...], preferred_element_type=jnp.float32)
        u2b = [u2[:, t * S:(t + 1) * S] for t in range(T)]
        v2 = _psp_mix([(M2c, u2b)], T)

        def store2(t, s):
            s2_ref[:, t * S:(t + 1) * S] = s

        _spike_scan(v2, theta2, ref2c, store2, T)

        # ---------------- layer 3 ----------------
        s2 = s2_ref[...].astype(COMPUTE_DTYPE)                      # exact 0/1 values
        u3m = jnp.dot(wup_ref[...], s2, preferred_element_type=jnp.float32)
        u3r = jnp.dot(wr_ref[...], xr_ref[...], preferred_element_type=jnp.float32)
        u3mb = [u3m[:, t * S:(t + 1) * S] for t in range(T)]
        u3rb = [u3r[:, t * S:(t + 1) * S] for t in range(T)]
        # main branch time-mixed with M3 (psp3), residual branch with M1 (psp1)
        v3 = _psp_mix([(M3c, u3mb), (M1c, u3rb)], T)

        def store3(t, s):
            o_ref[:, t * S:(t + 1) * S] = s.astype(o_ref.dtype)

        _spike_scan(v3, theta3, ref3c, store3, T)

    return kernel


# ------------------------------ pallas_call wrappers ---------------------------
def _full_spec(shape):
    return pl.BlockSpec(tuple(shape), lambda i: (0,) * len(shape))


def spiking_layer1_call(Wc1, patches1, T, S, out_dtype):
    C1 = Wc1.shape[0]
    kernel = make_layer1_kernel(T, S, psp_matrix(srm_kernel(0), T), THETA[0], ref_kernel(0))
    return pl.pallas_call(
        kernel,
        out_shape=jax.ShapeDtypeStruct((C1, T * S), out_dtype),
        grid=(1,),
        in_specs=[_full_spec(Wc1.shape), _full_spec(patches1.shape)],
        out_specs=_full_spec((C1, T * S)),
        compiler_params=pltpu.CompilerParams(dimension_semantics=("arbitrary",)),
    )(Wc1, patches1)


def spiking_layers23_call(Wc2, patches2, Wup, WR, patchesR, T, S):
    C2 = Wc2.shape[0]
    Cout = Wup.shape[0]     # C3 * 4 phase rows
    kernel = make_layer23_kernel(
        T, S,
        psp_matrix(srm_kernel(0), T),
        psp_matrix(srm_kernel(1), T),
        psp_matrix(srm_kernel(2), T),
        THETA[1], ref_kernel(1), THETA[2], ref_kernel(2))
    return pl.pallas_call(
        kernel,
        out_shape=jax.ShapeDtypeStruct((Cout, T * S), jnp.float32),
        grid=(1,),
        in_specs=[_full_spec(Wc2.shape), _full_spec(patches2.shape),
                  _full_spec(Wup.shape), _full_spec(WR.shape),
                  _full_spec(patchesR.shape)],
        out_specs=_full_spec((Cout, T * S)),
        scratch_shapes=[pltpu.VMEM((C2, T * S), jnp.float32)],   # s2 stays on-chip
        compiler_params=pltpu.CompilerParams(dimension_semantics=("arbitrary",)),
    )(Wc2, patches2, Wup, WR, patchesR)


# --------------------------- XLA data-movement glue ----------------------------
def _round_up(n, m):
    return ((n + m - 1) // m) * m


def _pad_axis0(a, mult):
    p = _round_up(a.shape[0], mult) - a.shape[0]
    return a if p == 0 else jnp.pad(a, ((0, p), (0, 0)))


def _pad_axis1(a, mult):
    p = _round_up(a.shape[1], mult) - a.shape[1]
    return a if p == 0 else jnp.pad(a, ((0, 0), (0, p)))


def build_patches(x_ctbhw, k, pad, mode):
    """(C, T, B, H, W) -> im2col patches (C*k*k, T*B*H*W); row = (c, ky, kx),
    lane = (t, b, y, x)."""
    C, Tn, B, H, W = x_ctbhw.shape
    xp = jnp.pad(x_ctbhw, ((0, 0), (0, 0), (0, 0), (pad, pad), (pad, pad)), mode=mode)
    cols = [xp[:, :, :, dy:dy + H, dx:dx + W] for dy in range(k) for dx in range(k)]
    p = jnp.stack(cols, axis=1)                      # (C, k*k, T, B, H, W)
    return p.reshape(C * k * k, Tn * B * H * W)


def prepare_weights(w_conv1, w_conv2, w_up1):
    """One-time weight preparation (run OUTSIDE jit): reshape to spatial-matmul form,
    zero-pad contraction dims to K_ALIGN, cast to the bf16 MXU operand dtype."""
    C1, Cin = w_conv1.shape[0], w_conv1.shape[1]
    C2 = w_conv2.shape[0]
    C3 = w_up1.shape[1]
    Wc1 = _pad_axis1(w_conv1.reshape(C1, -1), K_ALIGN).astype(COMPUTE_DTYPE)   # (C1, Cin*25)
    Wc2 = _pad_axis1(w_conv2.reshape(C2, -1), K_ALIGN).astype(COMPUTE_DTYPE)   # (C2, C1*9)
    # transpose-conv (k=2, s=2) as per-output-phase matmul: rows (c3, dy, dx), cols ci
    Wup = jnp.transpose(w_up1, (1, 2, 3, 0)).reshape(C3 * 4, w_up1.shape[0]).astype(COMPUTE_DTYPE)
    # x2 bilinear (align_corners=False) as depthwise taps over edge-replicated 3x3 patches
    WR = _pad_axis1(jnp.asarray(residual_block(Cin)), K_ALIGN).astype(COMPUTE_DTYPE)
    return Wc1, Wc2, Wup, WR


# -------------------------------- forward pass ---------------------------------
def network_basic_forward(spike_input, Wc1, Wc2, Wup, WR):
    B, Cin, H, W, T = spike_input.shape
    S = B * H * W
    C1 = Wc1.shape[0]
    C3 = Wup.shape[0] // 4

    x_ct = jnp.transpose(spike_input, (1, 4, 0, 2, 3))           # (Cin, T, B, H, W)

    # ---- layer 1: spike1( conv1( psp1(x) ) )  (conv and psp commute)
    patches1 = _pad_axis0(build_patches(x_ct, 5, 2, "constant"), K_ALIGN).astype(COMPUTE_DTYPE)
    s1 = spiking_layer1_call(Wc1, patches1, T, S, COMPUTE_DTYPE)  # (C1, T*S) 0/1 spikes

    # ---- layers 2 + 3 fused in one pallas_call
    patches2 = _pad_axis0(build_patches(s1.reshape(C1, T, B, H, W), 3, 1, "constant"), K_ALIGN)
    patchesR = _pad_axis0(build_patches(x_ct, 3, 1, "edge"), K_ALIGN).astype(COMPUTE_DTYPE)
    s3 = spiking_layers23_call(Wc2, patches2, Wup, WR, patchesR, T, S)   # (C3*4, T*S) f32

    # pixel-shuffle the (c3, dy, dx) phase rows back to (B, C3, 2H, 2W, T)
    s3 = s3.reshape(C3, 2, 2, T, B, H, W)
    s3 = jnp.transpose(s3, (4, 0, 5, 1, 6, 2, 3)).reshape(B, C3, 2 * H, 2 * W, T)
    return s3


if __name__ == "__main__":
    key = jax.random.PRNGKey(0)
    k1, k2, k3, kx = jax.random.split(key, 4)
    # slayer conv/convTranspose layers are bias-free; weightScale emulated by scaling.
    w_conv1 = jax.random.normal(k1, (8, 2, 5, 5), jnp.float32) * 10.0   # conv1 (2->8, 5x5, pad 2)
    w_conv2 = jax.random.normal(k2, (8, 8, 3, 3), jnp.float32) * 4.0    # conv2 (8->8, 3x3, pad 1)
    w_up1 = jax.random.normal(k3, (8, 2, 2, 2), jnp.float32) * 10.0     # upconv1 (8->2, k=2, s=2)
    spike_input = jax.random.bernoulli(kx, 0.3, (2, 2, 8, 8, 8)).astype(jnp.float32)

    params = prepare_weights(w_conv1, w_conv2, w_up1)    # once, outside jit
    fwd = jax.jit(network_basic_forward)
    out = jax.block_until_ready(fwd(spike_input, *params))
    assert out.shape == (2, 2, 16, 16, 8) and out.dtype == jnp.float32
    assert bool(jnp.all((out == 0.0) | (out == 1.0)))    # spike outputs are binary
    print("KERNEL_OK")
</pallas_src>

<mosaic_0001>
module attributes {stable_mosaic.version = 11 : i64} {
  func.func @kernel(%arg0: i32, %arg1: memref<8x64xbf16, #tpu.memory_space<vmem>>, %arg2: memref<64x1024xbf16, #tpu.memory_space<vmem>>, %arg3: memref<8x1024xbf16, #tpu.memory_space<vmem>>) attributes {dimension_semantics = [#tpu.dimension_semantics<arbitrary>], iteration_bounds = array<i64: 1>, scalar_prefetch = 0 : i64, scratch_operands = 0 : i64, tpu.core_type = #tpu.core_type<tc>, window_params = [{pipeline_mode = #tpu.pipeline_mode<synchronous>, transform_indices = @transform_0, window_bounds = array<i64: 8, 64>}, {pipeline_mode = #tpu.pipeline_mode<synchronous>, transform_indices = @transform_1, window_bounds = array<i64: 64, 1024>}, {pipeline_mode = #tpu.pipeline_mode<synchronous>, transform_indices = @transform_2, window_bounds = array<i64: 8, 1024>}]} {
    %c0 = arith.constant 0 : index
    %c0_0 = arith.constant 0 : index
    %0 = vector.load %arg1[%c0, %c0_0] : memref<8x64xbf16, #tpu.memory_space<vmem>>, vector<8x64xbf16>
    %c0_1 = arith.constant 0 : index
    %c0_2 = arith.constant 0 : index
    %1 = vector.load %arg2[%c0_1, %c0_2] : memref<64x1024xbf16, #tpu.memory_space<vmem>>, vector<64x1024xbf16>
    %cst = arith.constant dense<0.000000e+00> : vector<8x1024xf32>
    %2 = tpu.matmul %0, %1, %cst {dimension_numbers = #tpu.dot_dimension_numbers<[1], [0], [0], [1], [0, 0, 1, 1], [], []>} : vector<8x64xbf16>, vector<64x1024xbf16>, vector<8x1024xf32> -> vector<8x1024xf32>
    %3 = vector.extract_strided_slice %2 {offsets = [0, 0], sizes = [8, 128], strides = [1, 1]} : vector<8x1024xf32> to vector<8x128xf32>
    %4 = vector.extract_strided_slice %2 {offsets = [0, 128], sizes = [8, 128], strides = [1, 1]} : vector<8x1024xf32> to vector<8x128xf32>
    %5 = vector.extract_strided_slice %2 {offsets = [0, 256], sizes = [8, 128], strides = [1, 1]} : vector<8x1024xf32> to vector<8x128xf32>
    %6 = vector.extract_strided_slice %2 {offsets = [0, 384], sizes = [8, 128], strides = [1, 1]} : vector<8x1024xf32> to vector<8x128xf32>
    %7 = vector.extract_strided_slice %2 {offsets = [0, 512], sizes = [8, 128], strides = [1, 1]} : vector<8x1024xf32> to vector<8x128xf32>
    %8 = vector.extract_strided_slice %2 {offsets = [0, 640], sizes = [8, 128], strides = [1, 1]} : vector<8x1024xf32> to vector<8x128xf32>
    %9 = vector.extract_strided_slice %2 {offsets = [0, 768], sizes = [8, 128], strides = [1, 1]} : vector<8x1024xf32> to vector<8x128xf32>
    %cst_3 = arith.constant 0.000000e+00 : f32
    %10 = vector.broadcast %cst_3 : f32 to vector<8x128xf32>
    %cst_4 = arith.constant 0.735758901 : f32
    %11 = vector.broadcast %cst_4 : f32 to vector<8x128xf32>
    %12 = arith.mulf %11, %3 : vector<8x128xf32>
    %13 = arith.addf %12, %4 : vector<8x128xf32>
    %cst_5 = arith.constant 0.406005859 : f32
    %14 = vector.broadcast %cst_5 : f32 to vector<8x128xf32>
    %15 = arith.mulf %14, %3 : vector<8x128xf32>
    %cst_6 = arith.constant 0.735758901 : f32
    %16 = vector.broadcast %cst_6 : f32 to vector<8x128xf32>
    %17 = arith.mulf %16, %4 : vector<8x128xf32>
    %18 = arith.addf %15, %17 : vector<8x128xf32>
    %19 = arith.addf %18, %5 : vector<8x128xf32>
    %cst_7 = arith.constant 0.199148268 : f32
    %20 = vector.broadcast %cst_7 : f32 to vector<8x128xf32>
    %21 = arith.mulf %20, %3 : vector<8x128xf32>
    %cst_8 = arith.constant 0.406005859 : f32
    %22 = vector.broadcast %cst_8 : f32 to vector<8x128xf32>
    %23 = arith.mulf %22, %4 : vector<8x128xf32>
    %24 = arith.addf %21, %23 : vector<8x128xf32>
    %cst_9 = arith.constant 0.735758901 : f32
    %25 = vector.broadcast %cst_9 : f32 to vector<8x128xf32>
    %26 = arith.mulf %25, %5 : vector<8x128xf32>
    %27 = arith.addf %24, %26 : vector<8x128xf32>
    %28 = arith.addf %27, %6 : vector<8x128xf32>
    %cst_10 = arith.constant 0.091578193 : f32
    %29 = vector.broadcast %cst_10 : f32 to vector<8x128xf32>
    %30 = arith.mulf %29, %3 : vector<8x128xf32>
    %cst_11 = arith.constant 0.199148268 : f32
    %31 = vector.broadcast %cst_11 : f32 to vector<8x128xf32>
    %32 = arith.mulf %31, %4 : vector<8x128xf32>
    %33 = arith.addf %30, %32 : vector<8x128xf32>
    %cst_12 = arith.constant 0.406005859 : f32
    %34 = vector.broadcast %cst_12 : f32 to vector<8x128xf32>
    %35 = arith.mulf %34, %5 : vector<8x128xf32>
    %36 = arith.addf %33, %35 : vector<8x128xf32>
    %cst_13 = arith.constant 0.735758901 : f32
    %37 = vector.broadcast %cst_13 : f32 to vector<8x128xf32>
    %38 = arith.mulf %37, %6 : vector<8x128xf32>
    %39 = arith.addf %36, %38 : vector<8x128xf32>
    %40 = arith.addf %39, %7 : vector<8x128xf32>
    %cst_14 = arith.constant 0.0404276811 : f32
    %41 = vector.broadcast %cst_14 : f32 to vector<8x128xf32>
    %42 = arith.mulf %41, %3 : vector<8x128xf32>
    %cst_15 = arith.constant 0.091578193 : f32
    %43 = vector.broadcast %cst_15 : f32 to vector<8x128xf32>
    %44 = arith.mulf %43, %4 : vector<8x128xf32>
    %45 = arith.addf %42, %44 : vector<8x128xf32>
    %cst_16 = arith.constant 0.199148268 : f32
    %46 = vector.broadcast %cst_16 : f32 to vector<8x128xf32>
    %47 = arith.mulf %46, %5 : vector<8x128xf32>
    %48 = arith.addf %45, %47 : vector<8x128xf32>
    %cst_17 = arith.constant 0.406005859 : f32
    %49 = vector.broadcast %cst_17 : f32 to vector<8x128xf32>
    %50 = arith.mulf %49, %6 : vector<8x128xf32>
    %51 = arith.addf %48, %50 : vector<8x128xf32>
    %cst_18 = arith.constant 0.735758901 : f32
    %52 = vector.broadcast %cst_18 : f32 to vector<8x128xf32>
    %53 = arith.mulf %52, %7 : vector<8x128xf32>
    %54 = arith.addf %51, %53 : vector<8x128xf32>
    %55 = arith.addf %54, %8 : vector<8x128xf32>
    %cst_19 = arith.constant 0.017351266 : f32
    %56 = vector.broadcast %cst_19 : f32 to vector<8x128xf32>
    %57 = arith.mulf %56, %3 : vector<8x128xf32>
    %cst_20 = arith.constant 0.0404276811 : f32
    %58 = vector.broadcast %cst_20 : f32 to vector<8x128xf32>
    %59 = arith.mulf %58, %4 : vector<8x128xf32>
    %60 = arith.addf %57, %59 : vector<8x128xf32>
    %cst_21 = arith.constant 0.091578193 : f32
    %61 = vector.broadcast %cst_21 : f32 to vector<8x128xf32>
    %62 = arith.mulf %61, %5 : vector<8x128xf32>
    %63 = arith.addf %60, %62 : vector<8x128xf32>
    %cst_22 = arith.constant 0.199148268 : f32
    %64 = vector.broadcast %cst_22 : f32 to vector<8x128xf32>
    %65 = arith.mulf %64, %6 : vector<8x128xf32>
    %66 = arith.addf %63, %65 : vector<8x128xf32>
    %cst_23 = arith.constant 0.406005859 : f32
    %67 = vector.broadcast %cst_23 : f32 to vector<8x128xf32>
    %68 = arith.mulf %67, %7 : vector<8x128xf32>
    %69 = arith.addf %66, %68 : vector<8x128xf32>
    %cst_24 = arith.constant 0.735758901 : f32
    %70 = vector.broadcast %cst_24 : f32 to vector<8x128xf32>
    %71 = arith.mulf %70, %8 : vector<8x128xf32>
    %72 = arith.addf %69, %71 : vector<8x128xf32>
    %73 = arith.addf %72, %9 : vector<8x128xf32>
    %cst_25 = arith.constant 3.000000e+01 : f32
    %74 = vector.broadcast %cst_25 : f32 to vector<8x128xf32>
    %75 = arith.cmpf oge, %10, %74 : vector<8x128xf32>
    %76 = arith.extui %75 : vector<8x128xi1> to vector<8x128xi32>
    %77 = arith.sitofp %76 : vector<8x128xi32> to vector<8x128xf32>
    %78 = arith.truncf %77 : vector<8x128xf32> to vector<8x128xbf16>
    %c0_26 = arith.constant 0 : index
    %c0_27 = arith.constant 0 : index
    %79 = vector.load %arg3[%c0_26, %c0_27] : memref<8x1024xbf16, #tpu.memory_space<vmem>>, vector<8x128xbf16>
    tpu.vector_store %arg3[%c0_26, %c0_27], %78 {strides = array<i32>} : memref<8x1024xbf16, #tpu.memory_space<vmem>>, vector<8x128xbf16>,
    %cst_28 = arith.constant -3.000000e+01 : f32
    %80 = vector.broadcast %cst_28 : f32 to vector<8x128xf32>
    %81 = arith.mulf %80, %77 : vector<8x128xf32>
    %82 = arith.addf %3, %81 : vector<8x128xf32>
    %cst_29 = arith.constant -22.0727673 : f32
    %83 = vector.broadcast %cst_29 : f32 to vector<8x128xf32>
    %84 = arith.mulf %83, %77 : vector<8x128xf32>
    %85 = arith.addf %13, %84 : vector<8x128xf32>
    %cst_30 = arith.constant -12.1801758 : f32
    %86 = vector.broadcast %cst_30 : f32 to vector<8x128xf32>
    %87 = arith.mulf %86, %77 : vector<8x128xf32>
    %88 = arith.addf %19, %87 : vector<8x128xf32>
    %cst_31 = arith.constant -5.9744482 : f32
    %89 = vector.broadcast %cst_31 : f32 to vector<8x128xf32>
    %90 = arith.mulf %89, %77 : vector<8x128xf32>
    %91 = arith.addf %28, %90 : vector<8x128xf32>
    %cst_32 = arith.constant -2.74734592 : f32
    %92 = vector.broadcast %cst_32 : f32 to vector<8x128xf32>
    %93 = arith.mulf %92, %77 : vector<8x128xf32>
    %94 = arith.addf %40, %93 : vector<8x128xf32>
    %cst_33 = arith.constant -1.21283042 : f32
    %95 = vector.broadcast %cst_33 : f32 to vector<8x128xf32>
    %96 = arith.mulf %95, %77 : vector<8x128xf32>
    %97 = arith.addf %55, %96 : vector<8x128xf32>
    %cst_34 = arith.constant -5.205380e-01 : f32
    %98 = vector.broadcast %cst_34 : f32 to vector<8x128xf32>
    %99 = arith.mulf %98, %77 : vector<8x128xf32>
    %100 = arith.addf %73, %99 : vector<8x128xf32>
    %cst_35 = arith.constant 3.000000e+01 : f32
    %101 = vector.broadcast %cst_35 : f32 to vector<8x128xf32>
    %102 = arith.cmpf oge, %82, %101 : vector<8x128xf32>
    %103 = arith.extui %102 : vector<8x128xi1> to vector<8x128xi32>
    %104 = arith.sitofp %103 : vector<8x128xi32> to vector<8x128xf32>
    %105 = arith.truncf %104 : vector<8x128xf32> to vector<8x128xbf16>
    %c0_36 = arith.constant 0 : index
    %c128 = arith.constant 128 : index
    %106 = vector.load %arg3[%c0_36, %c128] : memref<8x1024xbf16, #tpu.memory_space<vmem>>, vector<8x128xbf16>
    tpu.vector_store %arg3[%c0_36, %c128], %105 {strides = array<i32>} : memref<8x1024xbf16, #tpu.memory_space<vmem>>, vector<8x128xbf16>,
    %cst_37 = arith.constant -3.000000e+01 : f32
    %107 = vector.broadcast %cst_37 : f32 to vector<8x128xf32>
    %108 = arith.mulf %107, %104 : vector<8x128xf32>
    %109 = arith.addf %85, %108 : vector<8x128xf32>
    %cst_38 = arith.constant -22.0727673 : f32
    %110 = vector.broadcast %cst_38 : f32 to vector<8x128xf32>
    %111 = arith.mulf %110, %104 : vector<8x128xf32>
    %112 = arith.addf %88, %111 : vector<8x128xf32>
    %cst_39 = arith.constant -12.1801758 : f32
    %113 = vector.broadcast %cst_39 : f32 to vector<8x128xf32>
    %114 = arith.mulf %113, %104 : vector<8x128xf32>
    %115 = arith.addf %91, %114 : vector<8x128xf32>
    %cst_40 = arith.constant -5.9744482 : f32
    %116 = vector.broadcast %cst_40 : f32 to vector<8x128xf32>
    %117 = arith.mulf %116, %104 : vector<8x128xf32>
    %118 = arith.addf %94, %117 : vector<8x128xf32>
    %cst_41 = arith.constant -2.74734592 : f32
    %119 = vector.broadcast %cst_41 : f32 to vector<8x128xf32>
    %120 = arith.mulf %119, %104 : vector<8x128xf32>
    %121 = arith.addf %97, %120 : vector<8x128xf32>
    %cst_42 = arith.constant -1.21283042 : f32
    %122 = vector.broadcast %cst_42 : f32 to vector<8x128xf32>
    %123 = arith.mulf %122, %104 : vector<8x128xf32>
    %124 = arith.addf %100, %123 : vector<8x128xf32>
    %cst_43 = arith.constant 3.000000e+01 : f32
    %125 = vector.broadcast %cst_43 : f32 to vector<8x128xf32>
    %126 = arith.cmpf oge, %109, %125 : vector<8x128xf32>
    %127 = arith.extui %126 : vector<8x128xi1> to vector<8x128xi32>
    %128 = arith.sitofp %127 : vector<8x128xi32> to vector<8x128xf32>
    %129 = arith.truncf %128 : vector<8x128xf32> to vector<8x128xbf16>
    %c0_44 = arith.constant 0 : index
    %c256 = arith.constant 256 : index
    %130 = vector.load %arg3[%c0_44, %c256] : memref<8x1024xbf16, #tpu.memory_space<vmem>>, vector<8x128xbf16>
    tpu.vector_store %arg3[%c0_44, %c256], %129 {strides = array<i32>} : memref<8x1024xbf16, #tpu.memory_space<vmem>>, vector<8x128xbf16>,
    %cst_45 = arith.constant -3.000000e+01 : f32
    %131 = vector.broadcast %cst_45 : f32 to vector<8x128xf32>
    %132 = arith.mulf %131, %128 : vector<8x128xf32>
    %133 = arith.addf %112, %132 : vector<8x128xf32>
    %cst_46 = arith.constant -22.0727673 : f32
    %134 = vector.broadcast %cst_46 : f32 to vector<8x128xf32>
    %135 = arith.mulf %134, %128 : vector<8x128xf32>
    %136 = arith.addf %115, %135 : vector<8x128xf32>
    %cst_47 = arith.constant -12.1801758 : f32
    %137 = vector.broadcast %cst_47 : f32 to vector<8x128xf32>
    %138 = arith.mulf %137, %128 : vector<8x128xf32>
    %139 = arith.addf %118, %138 : vector<8x128xf32>
    %cst_48 = arith.constant -5.9744482 : f32
    %140 = vector.broadcast %cst_48 : f32 to vector<8x128xf32>
    %141 = arith.mulf %140, %128 : vector<8x128xf32>
    %142 = arith.addf %121, %141 : vector<8x128xf32>
    %cst_49 = arith.constant -2.74734592 : f32
    %143 = vector.broadcast %cst_49 : f32 to vector<8x128xf32>
    %144 = arith.mulf %143, %128 : vector<8x128xf32>
    %145 = arith.addf %124, %144 : vector<8x128xf32>
    %cst_50 = arith.constant 3.000000e+01 : f32
    %146 = vector.broadcast %cst_50 : f32 to vector<8x128xf32>
    %147 = arith.cmpf oge, %133, %146 : vector<8x128xf32>
    %148 = arith.extui %147 : vector<8x128xi1> to vector<8x128xi32>
    %149 = arith.sitofp %148 : vector<8x128xi32> to vector<8x128xf32>
    %150 = arith.truncf %149 : vector<8x128xf32> to vector<8x128xbf16>
    %c0_51 = arith.constant 0 : index
    %c384 = arith.constant 384 : index
    %151 = vector.load %arg3[%c0_51, %c384] : memref<8x1024xbf16, #tpu.memory_space<vmem>>, vector<8x128xbf16>
    tpu.vector_store %arg3[%c0_51, %c384], %150 {strides = array<i32>} : memref<8x1024xbf16, #tpu.memory_space<vmem>>, vector<8x128xbf16>,
    %cst_52 = arith.constant -3.000000e+01 : f32
    %152 = vector.broadcast %cst_52 : f32 to vector<8x128xf32>
    %153 = arith.mulf %152, %149 : vector<8x128xf32>
    %154 = arith.addf %136, %153 : vector<8x128xf32>
    %cst_53 = arith.constant -22.0727673 : f32
    %155 = vector.broadcast %cst_53 : f32 to vector<8x128xf32>
    %156 = arith.mulf %155, %149 : vector<8x128xf32>
    %157 = arith.addf %139, %156 : vector<8x128xf32>
    %cst_54 = arith.constant -12.1801758 : f32
    %158 = vector.broadcast %cst_54 : f32 to vector<8x128xf32>
    %159 = arith.mulf %158, %149 : vector<8x128xf32>
    %160 = arith.addf %142, %159 : vector<8x128xf32>
    %cst_55 = arith.constant -5.9744482 : f32
    %161 = vector.broadcast %cst_55 : f32 to vector<8x128xf32>
    %162 = arith.mulf %161, %149 : vector<8x128xf32>
    %163 = arith.addf %145, %162 : vector<8x128xf32>
    %cst_56 = arith.constant 3.000000e+01 : f32
    %164 = vector.broadcast %cst_56 : f32 to vector<8x128xf32>
    %165 = arith.cmpf oge, %154, %164 : vector<8x128xf32>
    %166 = arith.extui %165 : vector<8x128xi1> to vector<8x128xi32>
    %167 = arith.sitofp %166 : vector<8x128xi32> to vector<8x128xf32>
    %168 = arith.truncf %167 : vector<8x128xf32> to vector<8x128xbf16>
    %c0_57 = arith.constant 0 : index
    %c512 = arith.constant 512 : index
    %169 = vector.load %arg3[%c0_57, %c512] : memref<8x1024xbf16, #tpu.memory_space<vmem>>, vector<8x128xbf16>
    tpu.vector_store %arg3[%c0_57, %c512], %168 {strides = array<i32>} : memref<8x1024xbf16, #tpu.memory_space<vmem>>, vector<8x128xbf16>,
    %cst_58 = arith.constant -3.000000e+01 : f32
    %170 = vector.broadcast %cst_58 : f32 to vector<8x128xf32>
    %171 = arith.mulf %170, %167 : vector<8x128xf32>
    %172 = arith.addf %157, %171 : vector<8x128xf32>
    %cst_59 = arith.constant -22.0727673 : f32
    %173 = vector.broadcast %cst_59 : f32 to vector<8x128xf32>
    %174 = arith.mulf %173, %167 : vector<8x128xf32>
    %175 = arith.addf %160, %174 : vector<8x128xf32>
    %cst_60 = arith.constant -12.1801758 : f32
    %176 = vector.broadcast %cst_60 : f32 to vector<8x128xf32>
    %177 = arith.mulf %176, %167 : vector<8x128xf32>
    %178 = arith.addf %163, %177 : vector<8x128xf32>
    %cst_61 = arith.constant 3.000000e+01 : f32
    %179 = vector.broadcast %cst_61 : f32 to vector<8x128xf32>
    %180 = arith.cmpf oge, %172, %179 : vector<8x128xf32>
    %181 = arith.extui %180 : vector<8x128xi1> to vector<8x128xi32>
    %182 = arith.sitofp %181 : vector<8x128xi32> to vector<8x128xf32>
    %183 = arith.truncf %182 : vector<8x128xf32> to vector<8x128xbf16>
    %c0_62 = arith.constant 0 : index
    %c640 = arith.constant 640 : index
    %184 = vector.load %arg3[%c0_62, %c640] : memref<8x1024xbf16, #tpu.memory_space<vmem>>, vector<8x128xbf16>
    tpu.vector_store %arg3[%c0_62, %c640], %183 {strides = array<i32>} : memref<8x1024xbf16, #tpu.memory_space<vmem>>, vector<8x128xbf16>,
    %cst_63 = arith.constant -3.000000e+01 : f32
    %185 = vector.broadcast %cst_63 : f32 to vector<8x128xf32>
    %186 = arith.mulf %185, %182 : vector<8x128xf32>
    %187 = arith.addf %175, %186 : vector<8x128xf32>
    %cst_64 = arith.constant -22.0727673 : f32
    %188 = vector.broadcast %cst_64 : f32 to vector<8x128xf32>
    %189 = arith.mulf %188, %182 : vector<8x128xf32>
    %190 = arith.addf %178, %189 : vector<8x128xf32>
    %cst_65 = arith.constant 3.000000e+01 : f32
    %191 = vector.broadcast %cst_65 : f32 to vector<8x128xf32>
    %192 = arith.cmpf oge, %187, %191 : vector<8x128xf32>
    %193 = arith.extui %192 : vector<8x128xi1> to vector<8x128xi32>
    %194 = arith.sitofp %193 : vector<8x128xi32> to vector<8x128xf32>
    %195 = arith.truncf %194 : vector<8x128xf32> to vector<8x128xbf16>
    %c0_66 = arith.constant 0 : index
    %c768 = arith.constant 768 : index
    %196 = vector.load %arg3[%c0_66, %c768] : memref<8x1024xbf16, #tpu.memory_space<vmem>>, vector<8x128xbf16>
    tpu.vector_store %arg3[%c0_66, %c768], %195 {strides = array<i32>} : memref<8x1024xbf16, #tpu.memory_space<vmem>>, vector<8x128xbf16>,
    %cst_67 = arith.constant -3.000000e+01 : f32
    %197 = vector.broadcast %cst_67 : f32 to vector<8x128xf32>
    %198 = arith.mulf %197, %194 : vector<8x128xf32>
    %199 = arith.addf %190, %198 : vector<8x128xf32>
    %cst_68 = arith.constant 3.000000e+01 : f32
    %200 = vector.broadcast %cst_68 : f32 to vector<8x128xf32>
    %201 = arith.cmpf oge, %199, %200 : vector<8x128xf32>
    %202 = arith.extui %201 : vector<8x128xi1> to vector<8x128xi32>
    %203 = arith.sitofp %202 : vector<8x128xi32> to vector<8x128xf32>
    %204 = arith.truncf %203 : vector<8x128xf32> to vector<8x128xbf16>
    %c0_69 = arith.constant 0 : index
    %c896 = arith.constant 896 : index
    %205 = vector.load %arg3[%c0_69, %c896] : memref<8x1024xbf16, #tpu.memory_space<vmem>>, vector<8x128xbf16>
    tpu.vector_store %arg3[%c0_69, %c896], %204 {strides = array<i32>} : memref<8x1024xbf16, #tpu.memory_space<vmem>>, vector<8x128xbf16>,
    return
  }
  func.func @transform_0(%arg0: i32) -> (i32, i32) {
    %c0_i32 = arith.constant 0 : i32
    %c0_i32_0 = arith.constant 0 : i32
    %c0_i32_1 = arith.constant 0 : i32
    return %c0_i32, %c0_i32_0 : i32, i32
  }
  func.func @transform_1(%arg0: i32) -> (i32, i32) {
    %c0_i32 = arith.constant 0 : i32
    %c0_i32_0 = arith.constant 0 : i32
    %c0_i32_1 = arith.constant 0 : i32
    return %c0_i32, %c0_i32_0 : i32, i32
  }
  func.func @transform_2(%arg0: i32) -> (i32, i32) {
    %c0_i32 = arith.constant 0 : i32
    %c0_i32_0 = arith.constant 0 : i32
    %c0_i32_1 = arith.constant 0 : i32
    return %c0_i32, %c0_i32_0 : i32, i32
  }
}

module attributes {stable_mosaic.version = 11 : i64} {
  func.func @kernel(%arg0: i32, %arg1: memref<8x80xbf16, #tpu.memory_space<vmem>>, %arg2: memref<80x1024xbf16, #tpu.memory_space<vmem>>, %arg3: memref<8x8xbf16, #tpu.memory_space<vmem>>, %arg4: memref<8x32xbf16, #tpu.memory_space<vmem>>, %arg5: memref<32x1024xbf16, #tpu.memory_space<vmem>>, %arg6: memref<8x1024xf32, #tpu.memory_space<vmem>>, %arg7: memref<8x1024xf32, #tpu.memory_space<vmem>>) attributes {dimension_semantics = [#tpu.dimension_semantics<arbitrary>], iteration_bounds = array<i64: 1>, scalar_prefetch = 0 : i64, scratch_operands = 1 : i64, tpu.core_type = #tpu.core_type<tc>, window_params = [{pipeline_mode = #tpu.pipeline_mode<synchronous>, transform_indices = @transform_0, window_bounds = array<i64: 8, 80>}, {pipeline_mode = #tpu.pipeline_mode<synchronous>, transform_indices = @transform_1, window_bounds = array<i64: 80, 1024>}, {pipeline_mode = #tpu.pipeline_mode<synchronous>, transform_indices = @transform_2, window_bounds = array<i64: 8, 8>}, {pipeline_mode = #tpu.pipeline_mode<synchronous>, transform_indices = @transform_3, window_bounds = array<i64: 8, 32>}, {pipeline_mode = #tpu.pipeline_mode<synchronous>, transform_indices = @transform_4, window_bounds = array<i64: 32, 1024>}, {pipeline_mode = #tpu.pipeline_mode<synchronous>, transform_indices = @transform_5, window_bounds = array<i64: 8, 1024>}]} {
    %c0 = arith.constant 0 : index
    %c0_0 = arith.constant 0 : index
    %0 = vector.load %arg1[%c0, %c0_0] : memref<8x80xbf16, #tpu.memory_space<vmem>>, vector<8x80xbf16>
    %c0_1 = arith.constant 0 : index
    %c0_2 = arith.constant 0 : index
    %1 = vector.load %arg2[%c0_1, %c0_2] : memref<80x1024xbf16, #tpu.memory_space<vmem>>, vector<80x1024xbf16>
    %cst = arith.constant dense<0.000000e+00> : vector<8x1024xf32>
    %2 = tpu.matmul %0, %1, %cst {dimension_numbers = #tpu.dot_dimension_numbers<[1], [0], [0], [1], [0, 0, 1, 1], [], []>} : vector<8x80xbf16>, vector<80x1024xbf16>, vector<8x1024xf32> -> vector<8x1024xf32>
    %3 = vector.extract_strided_slice %2 {offsets = [0, 0], sizes = [8, 128], strides = [1, 1]} : vector<8x1024xf32> to vector<8x128xf32>
    %4 = vector.extract_strided_slice %2 {offsets = [0, 128], sizes = [8, 128], strides = [1, 1]} : vector<8x1024xf32> to vector<8x128xf32>
    %5 = vector.extract_strided_slice %2 {offsets = [0, 256], sizes = [8, 128], strides = [1, 1]} : vector<8x1024xf32> to vector<8x128xf32>
    %6 = vector.extract_strided_slice %2 {offsets = [0, 384], sizes = [8, 128], strides = [1, 1]} : vector<8x1024xf32> to vector<8x128xf32>
    %7 = vector.extract_strided_slice %2 {offsets = [0, 512], sizes = [8, 128], strides = [1, 1]} : vector<8x1024xf32> to vector<8x128xf32>
    %8 = vector.extract_strided_slice %2 {offsets = [0, 640], sizes = [8, 128], strides = [1, 1]} : vector<8x1024xf32> to vector<8x128xf32>
    %9 = vector.extract_strided_slice %2 {offsets = [0, 768], sizes = [8, 128], strides = [1, 1]} : vector<8x1024xf32> to vector<8x128xf32>
    %cst_3 = arith.constant 0.000000e+00 : f32
    %10 = vector.broadcast %cst_3 : f32 to vector<8x128xf32>
    %cst_4 = arith.constant 0.824360609 : f32
    %11 = vector.broadcast %cst_4 : f32 to vector<8x128xf32>
    %12 = arith.mulf %11, %3 : vector<8x128xf32>
    %cst_5 = arith.constant 0.824360609 : f32
    %13 = vector.broadcast %cst_5 : f32 to vector<8x128xf32>
    %14 = arith.mulf %13, %4 : vector<8x128xf32>
    %15 = arith.addf %3, %14 : vector<8x128xf32>
    %cst_6 = arith.constant 9.097960e-01 : f32
    %16 = vector.broadcast %cst_6 : f32 to vector<8x128xf32>
    %17 = arith.mulf %16, %3 : vector<8x128xf32>
    %18 = arith.addf %17, %4 : vector<8x128xf32>
    %cst_7 = arith.constant 0.824360609 : f32
    %19 = vector.broadcast %cst_7 : f32 to vector<8x128xf32>
    %20 = arith.mulf %19, %5 : vector<8x128xf32>
    %21 = arith.addf %18, %20 : vector<8x128xf32>
    %cst_8 = arith.constant 0.735758901 : f32
    %22 = vector.broadcast %cst_8 : f32 to vector<8x128xf32>
    %23 = arith.mulf %22, %3 : vector<8x128xf32>
    %cst_9 = arith.constant 9.097960e-01 : f32
    %24 = vector.broadcast %cst_9 : f32 to vector<8x128xf32>
    %25 = arith.mulf %24, %4 : vector<8x128xf32>
    %26 = arith.addf %23, %25 : vector<8x128xf32>
    %27 = arith.addf %26, %5 : vector<8x128xf32>
    %cst_10 = arith.constant 0.824360609 : f32
    %28 = vector.broadcast %cst_10 : f32 to vector<8x128xf32>
    %29 = arith.mulf %28, %6 : vector<8x128xf32>
    %30 = arith.addf %27, %29 : vector<8x128xf32>
    %cst_11 = arith.constant 0.557825387 : f32
    %31 = vector.broadcast %cst_11 : f32 to vector<8x128xf32>
    %32 = arith.mulf %31, %3 : vector<8x128xf32>
    %cst_12 = arith.constant 0.735758901 : f32
    %33 = vector.broadcast %cst_12 : f32 to vector<8x128xf32>
    %34 = arith.mulf %33, %4 : vector<8x128xf32>
    %35 = arith.addf %32, %34 : vector<8x128xf32>
    %cst_13 = arith.constant 9.097960e-01 : f32
    %36 = vector.broadcast %cst_13 : f32 to vector<8x128xf32>
    %37 = arith.mulf %36, %5 : vector<8x128xf32>
    %38 = arith.addf %35, %37 : vector<8x128xf32>
    %39 = arith.addf %38, %6 : vector<8x128xf32>
    %cst_14 = arith.constant 0.824360609 : f32
    %40 = vector.broadcast %cst_14 : f32 to vector<8x128xf32>
    %41 = arith.mulf %40, %7 : vector<8x128xf32>
    %42 = arith.addf %39, %41 : vector<8x128xf32>
    %cst_15 = arith.constant 0.406005859 : f32
    %43 = vector.broadcast %cst_15 : f32 to vector<8x128xf32>
    %44 = arith.mulf %43, %3 : vector<8x128xf32>
    %cst_16 = arith.constant 0.557825387 : f32
    %45 = vector.broadcast %cst_16 : f32 to vector<8x128xf32>
    %46 = arith.mulf %45, %4 : vector<8x128xf32>
    %47 = arith.addf %44, %46 : vector<8x128xf32>
    %cst_17 = arith.constant 0.735758901 : f32
    %48 = vector.broadcast %cst_17 : f32 to vector<8x128xf32>
    %49 = arith.mulf %48, %5 : vector<8x128xf32>
    %50 = arith.addf %47, %49 : vector<8x128xf32>
    %cst_18 = arith.constant 9.097960e-01 : f32
    %51 = vector.broadcast %cst_18 : f32 to vector<8x128xf32>
    %52 = arith.mulf %51, %6 : vector<8x128xf32>
    %53 = arith.addf %50, %52 : vector<8x128xf32>
    %54 = arith.addf %53, %7 : vector<8x128xf32>
    %cst_19 = arith.constant 0.824360609 : f32
    %55 = vector.broadcast %cst_19 : f32 to vector<8x128xf32>
    %56 = arith.mulf %55, %8 : vector<8x128xf32>
    %57 = arith.addf %54, %56 : vector<8x128xf32>
    %cst_20 = arith.constant 0.287297487 : f32
    %58 = vector.broadcast %cst_20 : f32 to vector<8x128xf32>
    %59 = arith.mulf %58, %3 : vector<8x128xf32>
    %cst_21 = arith.constant 0.406005859 : f32
    %60 = vector.broadcast %cst_21 : f32 to vector<8x128xf32>
    %61 = arith.mulf %60, %4 : vector<8x128xf32>
    %62 = arith.addf %59, %61 : vector<8x128xf32>
    %cst_22 = arith.constant 0.557825387 : f32
    %63 = vector.broadcast %cst_22 : f32 to vector<8x128xf32>
    %64 = arith.mulf %63, %5 : vector<8x128xf32>
    %65 = arith.addf %62, %64 : vector<8x128xf32>
    %cst_23 = arith.constant 0.735758901 : f32
    %66 = vector.broadcast %cst_23 : f32 to vector<8x128xf32>
    %67 = arith.mulf %66, %6 : vector<8x128xf32>
    %68 = arith.addf %65, %67 : vector<8x128xf32>
    %cst_24 = arith.constant 9.097960e-01 : f32
    %69 = vector.broadcast %cst_24 : f32 to vector<8x128xf32>
    %70 = arith.mulf %69, %7 : vector<8x128xf32>
    %71 = arith.addf %68, %70 : vector<8x128xf32>
    %72 = arith.addf %71, %8 : vector<8x128xf32>
    %cst_25 = arith.constant 0.824360609 : f32
    %73 = vector.broadcast %cst_25 : f32 to vector<8x128xf32>
    %74 = arith.mulf %73, %9 : vector<8x128xf32>
    %75 = arith.addf %72, %74 : vector<8x128xf32>
    %cst_26 = arith.constant 5.000000e+01 : f32
    %76 = vector.broadcast %cst_26 : f32 to vector<8x128xf32>
    %77 = arith.cmpf oge, %10, %76 : vector<8x128xf32>
    %78 = arith.extui %77 : vector<8x128xi1> to vector<8x128xi32>
    %79 = arith.sitofp %78 : vector<8x128xi32> to vector<8x128xf32>
    %c0_27 = arith.constant 0 : index
    %c0_28 = arith.constant 0 : index
    %80 = vector.load %arg7[%c0_27, %c0_28] : memref<8x1024xf32, #tpu.memory_space<vmem>>, vector<8x128xf32>
    tpu.vector_store %arg7[%c0_27, %c0_28], %79 {strides = array<i32>} : memref<8x1024xf32, #tpu.memory_space<vmem>>, vector<8x128xf32>,
    %cst_29 = arith.constant -41.2180328 : f32
    %81 = vector.broadcast %cst_29 : f32 to vector<8x128xf32>
    %82 = arith.mulf %81, %79 : vector<8x128xf32>
    %83 = arith.addf %12, %82 : vector<8x128xf32>
    %cst_30 = arith.constant -5.000000e+01 : f32
    %84 = vector.broadcast %cst_30 : f32 to vector<8x128xf32>
    %85 = arith.mulf %84, %79 : vector<8x128xf32>
    %86 = arith.addf %15, %85 : vector<8x128xf32>
    %cst_31 = arith.constant -4.548980e+01 : f32
    %87 = vector.broadcast %cst_31 : f32 to vector<8x128xf32>
    %88 = arith.mulf %87, %79 : vector<8x128xf32>
    %89 = arith.addf %21, %88 : vector<8x128xf32>
    %cst_32 = arith.constant -36.7879448 : f32
    %90 = vector.broadcast %cst_32 : f32 to vector<8x128xf32>
    %91 = arith.mulf %90, %79 : vector<8x128xf32>
    %92 = arith.addf %30, %91 : vector<8x128xf32>
    %cst_33 = arith.constant -27.8912697 : f32
    %93 = vector.broadcast %cst_33 : f32 to vector<8x128xf32>
    %94 = arith.mulf %93, %79 : vector<8x128xf32>
    %95 = arith.addf %42, %94 : vector<8x128xf32>
    %cst_34 = arith.constant -20.300293 : f32
    %96 = vector.broadcast %cst_34 : f32 to vector<8x128xf32>
    %97 = arith.mulf %96, %79 : vector<8x128xf32>
    %98 = arith.addf %57, %97 : vector<8x128xf32>
    %cst_35 = arith.constant -14.3648748 : f32
    %99 = vector.broadcast %cst_35 : f32 to vector<8x128xf32>
    %100 = arith.mulf %99, %79 : vector<8x128xf32>
    %101 = arith.addf %75, %100 : vector<8x128xf32>
    %cst_36 = arith.constant 5.000000e+01 : f32
    %102 = vector.broadcast %cst_36 : f32 to vector<8x128xf32>
    %103 = arith.cmpf oge, %83, %102 : vector<8x128xf32>
    %104 = arith.extui %103 : vector<8x128xi1> to vector<8x128xi32>
    %105 = arith.sitofp %104 : vector<8x128xi32> to vector<8x128xf32>
    %c0_37 = arith.constant 0 : index
    %c128 = arith.constant 128 : index
    %106 = vector.load %arg7[%c0_37, %c128] : memref<8x1024xf32, #tpu.memory_space<vmem>>, vector<8x128xf32>
    tpu.vector_store %arg7[%c0_37, %c128], %105 {strides = array<i32>} : memref<8x1024xf32, #tpu.memory_space<vmem>>, vector<8x128xf32>,
    %cst_38 = arith.constant -41.2180328 : f32
    %107 = vector.broadcast %cst_38 : f32 to vector<8x128xf32>
    %108 = arith.mulf %107, %105 : vector<8x128xf32>
    %109 = arith.addf %86, %108 : vector<8x128xf32>
    %cst_39 = arith.constant -5.000000e+01 : f32
    %110 = vector.broadcast %cst_39 : f32 to vector<8x128xf32>
    %111 = arith.mulf %110, %105 : vector<8x128xf32>
    %112 = arith.addf %89, %111 : vector<8x128xf32>
    %cst_40 = arith.constant -4.548980e+01 : f32
    %113 = vector.broadcast %cst_40 : f32 to vector<8x128xf32>
    %114 = arith.mulf %113, %105 : vector<8x128xf32>
    %115 = arith.addf %92, %114 : vector<8x128xf32>
    %cst_41 = arith.constant -36.7879448 : f32
    %116 = vector.broadcast %cst_41 : f32 to vector<8x128xf32>
    %117 = arith.mulf %116, %105 : vector<8x128xf32>
    %118 = arith.addf %95, %117 : vector<8x128xf32>
    %cst_42 = arith.constant -27.8912697 : f32
    %119 = vector.broadcast %cst_42 : f32 to vector<8x128xf32>
    %120 = arith.mulf %119, %105 : vector<8x128xf32>
    %121 = arith.addf %98, %120 : vector<8x128xf32>
    %cst_43 = arith.constant -20.300293 : f32
    %122 = vector.broadcast %cst_43 : f32 to vector<8x128xf32>
    %123 = arith.mulf %122, %105 : vector<8x128xf32>
    %124 = arith.addf %101, %123 : vector<8x128xf32>
    %cst_44 = arith.constant 5.000000e+01 : f32
    %125 = vector.broadcast %cst_44 : f32 to vector<8x128xf32>
    %126 = arith.cmpf oge, %109, %125 : vector<8x128xf32>
    %127 = arith.extui %126 : vector<8x128xi1> to vector<8x128xi32>
    %128 = arith.sitofp %127 : vector<8x128xi32> to vector<8x128xf32>
    %c0_45 = arith.constant 0 : index
    %c256 = arith.constant 256 : index
    %129 = vector.load %arg7[%c0_45, %c256] : memref<8x1024xf32, #tpu.memory_space<vmem>>, vector<8x128xf32>
    tpu.vector_store %arg7[%c0_45, %c256], %128 {strides = array<i32>} : memref<8x1024xf32, #tpu.memory_space<vmem>>, vector<8x128xf32>,
    %cst_46 = arith.constant -41.2180328 : f32
    %130 = vector.broadcast %cst_46 : f32 to vector<8x128xf32>
    %131 = arith.mulf %130, %128 : vector<8x128xf32>
    %132 = arith.addf %112, %131 : vector<8x128xf32>
    %cst_47 = arith.constant -5.000000e+01 : f32
    %133 = vector.broadcast %cst_47 : f32 to vector<8x128xf32>
    %134 = arith.mulf %133, %128 : vector<8x128xf32>
    %135 = arith.addf %115, %134 : vector<8x128xf32>
    %cst_48 = arith.constant -4.548980e+01 : f32
    %136 = vector.broadcast %cst_48 : f32 to vector<8x128xf32>
    %137 = arith.mulf %136, %128 : vector<8x128xf32>
    %138 = arith.addf %118, %137 : vector<8x128xf32>
    %cst_49 = arith.constant -36.7879448 : f32
    %139 = vector.broadcast %cst_49 : f32 to vector<8x128xf32>
    %140 = arith.mulf %139, %128 : vector<8x128xf32>
    %141 = arith.addf %121, %140 : vector<8x128xf32>
    %cst_50 = arith.constant -27.8912697 : f32
    %142 = vector.broadcast %cst_50 : f32 to vector<8x128xf32>
    %143 = arith.mulf %142, %128 : vector<8x128xf32>
    %144 = arith.addf %124, %143 : vector<8x128xf32>
    %cst_51 = arith.constant 5.000000e+01 : f32
    %145 = vector.broadcast %cst_51 : f32 to vector<8x128xf32>
    %146 = arith.cmpf oge, %132, %145 : vector<8x128xf32>
    %147 = arith.extui %146 : vector<8x128xi1> to vector<8x128xi32>
    %148 = arith.sitofp %147 : vector<8x128xi32> to vector<8x128xf32>
    %c0_52 = arith.constant 0 : index
    %c384 = arith.constant 384 : index
    %149 = vector.load %arg7[%c0_52, %c384] : memref<8x1024xf32, #tpu.memory_space<vmem>>, vector<8x128xf32>
    tpu.vector_store %arg7[%c0_52, %c384], %148 {strides = array<i32>} : memref<8x1024xf32, #tpu.memory_space<vmem>>, vector<8x128xf32>,
    %cst_53 = arith.constant -41.2180328 : f32
    %150 = vector.broadcast %cst_53 : f32 to vector<8x128xf32>
    %151 = arith.mulf %150, %148 : vector<8x128xf32>
    %152 = arith.addf %135, %151 : vector<8x128xf32>
    %cst_54 = arith.constant -5.000000e+01 : f32
    %153 = vector.broadcast %cst_54 : f32 to vector<8x128xf32>
    %154 = arith.mulf %153, %148 : vector<8x128xf32>
    %155 = arith.addf %138, %154 : vector<8x128xf32>
    %cst_55 = arith.constant -4.548980e+01 : f32
    %156 = vector.broadcast %cst_55 : f32 to vector<8x128xf32>
    %157 = arith.mulf %156, %148 : vector<8x128xf32>
    %158 = arith.addf %141, %157 : vector<8x128xf32>
    %cst_56 = arith.constant -36.7879448 : f32
    %159 = vector.broadcast %cst_56 : f32 to vector<8x128xf32>
    %160 = arith.mulf %159, %148 : vector<8x128xf32>
    %161 = arith.addf %144, %160 : vector<8x128xf32>
    %cst_57 = arith.constant 5.000000e+01 : f32
    %162 = vector.broadcast %cst_57 : f32 to vector<8x128xf32>
    %163 = arith.cmpf oge, %152, %162 : vector<8x128xf32>
    %164 = arith.extui %163 : vector<8x128xi1> to vector<8x128xi32>
    %165 = arith.sitofp %164 : vector<8x128xi32> to vector<8x128xf32>
    %c0_58 = arith.constant 0 : index
    %c512 = arith.constant 512 : index
    %166 = vector.load %arg7[%c0_58, %c512] : memref<8x1024xf32, #tpu.memory_space<vmem>>, vector<8x128xf32>
    tpu.vector_store %arg7[%c0_58, %c512], %165 {strides = array<i32>} : memref<8x1024xf32, #tpu.memory_space<vmem>>, vector<8x128xf32>,
    %cst_59 = arith.constant -41.2180328 : f32
    %167 = vector.broadcast %cst_59 : f32 to vector<8x128xf32>
    %168 = arith.mulf %167, %165 : vector<8x128xf32>
    %169 = arith.addf %155, %168 : vector<8x128xf32>
    %cst_60 = arith.constant -5.000000e+01 : f32
    %170 = vector.broadcast %cst_60 : f32 to vector<8x128xf32>
    %171 = arith.mulf %170, %165 : vector<8x128xf32>
    %172 = arith.addf %158, %171 : vector<8x128xf32>
    %cst_61 = arith.constant -4.548980e+01 : f32
    %173 = vector.broadcast %cst_61 : f32 to vector<8x128xf32>
    %174 = arith.mulf %173, %165 : vector<8x128xf32>
    %175 = arith.addf %161, %174 : vector<8x128xf32>
    %cst_62 = arith.constant 5.000000e+01 : f32
    %176 = vector.broadcast %cst_62 : f32 to vector<8x128xf32>
    %177 = arith.cmpf oge, %169, %176 : vector<8x128xf32>
    %178 = arith.extui %177 : vector<8x128xi1> to vector<8x128xi32>
    %179 = arith.sitofp %178 : vector<8x128xi32> to vector<8x128xf32>
    %c0_63 = arith.constant 0 : index
    %c640 = arith.constant 640 : index
    %180 = vector.load %arg7[%c0_63, %c640] : memref<8x1024xf32, #tpu.memory_space<vmem>>, vector<8x128xf32>
    tpu.vector_store %arg7[%c0_63, %c640], %179 {strides = array<i32>} : memref<8x1024xf32, #tpu.memory_space<vmem>>, vector<8x128xf32>,
    %cst_64 = arith.constant -41.2180328 : f32
    %181 = vector.broadcast %cst_64 : f32 to vector<8x128xf32>
    %182 = arith.mulf %181, %179 : vector<8x128xf32>
    %183 = arith.addf %172, %182 : vector<8x128xf32>
    %cst_65 = arith.constant -5.000000e+01 : f32
    %184 = vector.broadcast %cst_65 : f32 to vector<8x128xf32>
    %185 = arith.mulf %184, %179 : vector<8x128xf32>
    %186 = arith.addf %175, %185 : vector<8x128xf32>
    %cst_66 = arith.constant 5.000000e+01 : f32
    %187 = vector.broadcast %cst_66 : f32 to vector<8x128xf32>
    %188 = arith.cmpf oge, %183, %187 : vector<8x128xf32>
    %189 = arith.extui %188 : vector<8x128xi1> to vector<8x128xi32>
    %190 = arith.sitofp %189 : vector<8x128xi32> to vector<8x128xf32>
    %c0_67 = arith.constant 0 : index
    %c768 = arith.constant 768 : index
    %191 = vector.load %arg7[%c0_67, %c768] : memref<8x1024xf32, #tpu.memory_space<vmem>>, vector<8x128xf32>
    tpu.vector_store %arg7[%c0_67, %c768], %190 {strides = array<i32>} : memref<8x1024xf32, #tpu.memory_space<vmem>>, vector<8x128xf32>,
    %cst_68 = arith.constant -41.2180328 : f32
    %192 = vector.broadcast %cst_68 : f32 to vector<8x128xf32>
    %193 = arith.mulf %192, %190 : vector<8x128xf32>
    %194 = arith.addf %186, %193 : vector<8x128xf32>
    %cst_69 = arith.constant 5.000000e+01 : f32
    %195 = vector.broadcast %cst_69 : f32 to vector<8x128xf32>
    %196 = arith.cmpf oge, %194, %195 : vector<8x128xf32>
    %197 = arith.extui %196 : vector<8x128xi1> to vector<8x128xi32>
    %198 = arith.sitofp %197 : vector<8x128xi32> to vector<8x128xf32>
    %c0_70 = arith.constant 0 : index
    %c896 = arith.constant 896 : index
    %199 = vector.load %arg7[%c0_70, %c896] : memref<8x1024xf32, #tpu.memory_space<vmem>>, vector<8x128xf32>
    tpu.vector_store %arg7[%c0_70, %c896], %198 {strides = array<i32>} : memref<8x1024xf32, #tpu.memory_space<vmem>>, vector<8x128xf32>,
    %c0_71 = arith.constant 0 : index
    %c0_72 = arith.constant 0 : index
    %200 = vector.load %arg7[%c0_71, %c0_72] : memref<8x1024xf32, #tpu.memory_space<vmem>>, vector<8x1024xf32>
    %201 = arith.truncf %200 : vector<8x1024xf32> to vector<8x1024xbf16>
    %c0_73 = arith.constant 0 : index
    %c0_74 = arith.constant 0 : index
    %202 = vector.load %arg3[%c0_73, %c0_74] : memref<8x8xbf16, #tpu.memory_space<vmem>>, vector<8x8xbf16>
    %cst_75 = arith.constant dense<0.000000e+00> : vector<8x1024xf32>
    %203 = tpu.matmul %202, %201, %cst_75 {dimension_numbers = #tpu.dot_dimension_numbers<[1], [0], [0], [1], [0, 0, 1, 1], [], []>} : vector<8x8xbf16>, vector<8x1024xbf16>, vector<8x1024xf32> -> vector<8x1024xf32>
    %c0_76 = arith.constant 0 : index
    %c0_77 = arith.constant 0 : index
    %204 = vector.load %arg4[%c0_76, %c0_77] : memref<8x32xbf16, #tpu.memory_space<vmem>>, vector<8x32xbf16>
    %c0_78 = arith.constant 0 : index
    %c0_79 = arith.constant 0 : index
    %205 = vector.load %arg5[%c0_78, %c0_79] : memref<32x1024xbf16, #tpu.memory_space<vmem>>, vector<32x1024xbf16>
    %cst_80 = arith.constant dense<0.000000e+00> : vector<8x1024xf32>
    %206 = tpu.matmul %204, %205, %cst_80 {dimension_numbers = #tpu.dot_dimension_numbers<[1], [0], [0], [1], [0, 0, 1, 1], [], []>} : vector<8x32xbf16>, vector<32x1024xbf16>, vector<8x1024xf32> -> vector<8x1024xf32>
    %207 = vector.extract_strided_slice %203 {offsets = [0, 0], sizes = [8, 128], strides = [1, 1]} : vector<8x1024xf32> to vector<8x128xf32>
    %208 = vector.extract_strided_slice %203 {offsets = [0, 128], sizes = [8, 128], strides = [1, 1]} : vector<8x1024xf32> to vector<8x128xf32>
    %209 = vector.extract_strided_slice %203 {offsets = [0, 256], sizes = [8, 128], strides = [1, 1]} : vector<8x1024xf32> to vector<8x128xf32>
    %210 = vector.extract_strided_slice %203 {offsets = [0, 384], sizes = [8, 128], strides = [1, 1]} : vector<8x1024xf32> to vector<8x128xf32>
    %211 = vector.extract_strided_slice %203 {offsets = [0, 512], sizes = [8, 128], strides = [1, 1]} : vector<8x1024xf32> to vector<8x128xf32>
    %212 = vector.extract_strided_slice %203 {offsets = [0, 640], sizes = [8, 128], strides = [1, 1]} : vector<8x1024xf32> to vector<8x128xf32>
    %213 = vector.extract_strided_slice %203 {offsets = [0, 768], sizes = [8, 128], strides = [1, 1]} : vector<8x1024xf32> to vector<8x128xf32>
    %214 = vector.extract_strided_slice %206 {offsets = [0, 0], sizes = [8, 128], strides = [1, 1]} : vector<8x1024xf32> to vector<8x128xf32>
    %215 = vector.extract_strided_slice %206 {offsets = [0, 128], sizes = [8, 128], strides = [1, 1]} : vector<8x1024xf32> to vector<8x128xf32>
    %216 = vector.extract_strided_slice %206 {offsets = [0, 256], sizes = [8, 128], strides = [1, 1]} : vector<8x1024xf32> to vector<8x128xf32>
    %217 = vector.extract_strided_slice %206 {offsets = [0, 384], sizes = [8, 128], strides = [1, 1]} : vector<8x1024xf32> to vector<8x128xf32>
    %218 = vector.extract_strided_slice %206 {offsets = [0, 512], sizes = [8, 128], strides = [1, 1]} : vector<8x1024xf32> to vector<8x128xf32>
    %219 = vector.extract_strided_slice %206 {offsets = [0, 640], sizes = [8, 128], strides = [1, 1]} : vector<8x1024xf32> to vector<8x128xf32>
    %220 = vector.extract_strided_slice %206 {offsets = [0, 768], sizes = [8, 128], strides = [1, 1]} : vector<8x1024xf32> to vector<8x128xf32>
    %cst_81 = arith.constant 0.000000e+00 : f32
    %221 = vector.broadcast %cst_81 : f32 to vector<8x128xf32>
    %cst_82 = arith.constant 5.292500e-01 : f32
    %222 = vector.broadcast %cst_82 : f32 to vector<8x128xf32>
    %223 = arith.mulf %222, %207 : vector<8x128xf32>
    %224 = arith.addf %223, %214 : vector<8x128xf32>
    %cst_83 = arith.constant 0.824360609 : f32
    %225 = vector.broadcast %cst_83 : f32 to vector<8x128xf32>
    %226 = arith.mulf %225, %207 : vector<8x128xf32>
    %cst_84 = arith.constant 5.292500e-01 : f32
    %227 = vector.broadcast %cst_84 : f32 to vector<8x128xf32>
    %228 = arith.mulf %227, %208 : vector<8x128xf32>
    %229 = arith.addf %226, %228 : vector<8x128xf32>
    %cst_85 = arith.constant 0.735758901 : f32
    %230 = vector.broadcast %cst_85 : f32 to vector<8x128xf32>
    %231 = arith.mulf %230, %214 : vector<8x128xf32>
    %232 = arith.addf %229, %231 : vector<8x128xf32>
    %233 = arith.addf %232, %215 : vector<8x128xf32>
    %cst_86 = arith.constant 0.963019073 : f32
    %234 = vector.broadcast %cst_86 : f32 to vector<8x128xf32>
    %235 = arith.mulf %234, %207 : vector<8x128xf32>
    %cst_87 = arith.constant 0.824360609 : f32
    %236 = vector.broadcast %cst_87 : f32 to vector<8x128xf32>
    %237 = arith.mulf %236, %208 : vector<8x128xf32>
    %238 = arith.addf %235, %237 : vector<8x128xf32>
    %cst_88 = arith.constant 5.292500e-01 : f32
    %239 = vector.broadcast %cst_88 : f32 to vector<8x128xf32>
    %240 = arith.mulf %239, %209 : vector<8x128xf32>
    %241 = arith.addf %238, %240 : vector<8x128xf32>
    %cst_89 = arith.constant 0.406005859 : f32
    %242 = vector.broadcast %cst_89 : f32 to vector<8x128xf32>
    %243 = arith.mulf %242, %214 : vector<8x128xf32>
    %244 = arith.addf %241, %243 : vector<8x128xf32>
    %cst_90 = arith.constant 0.735758901 : f32
    %245 = vector.broadcast %cst_90 : f32 to vector<8x128xf32>
    %246 = arith.mulf %245, %215 : vector<8x128xf32>
    %247 = arith.addf %244, %246 : vector<8x128xf32>
    %248 = arith.addf %247, %216 : vector<8x128xf32>
    %cst_91 = arith.constant 0.963019073 : f32
    %249 = vector.broadcast %cst_91 : f32 to vector<8x128xf32>
    %250 = arith.mulf %249, %208 : vector<8x128xf32>
    %251 = arith.addf %207, %250 : vector<8x128xf32>
    %cst_92 = arith.constant 0.824360609 : f32
    %252 = vector.broadcast %cst_92 : f32 to vector<8x128xf32>
    %253 = arith.mulf %252, %209 : vector<8x128xf32>
    %254 = arith.addf %251, %253 : vector<8x128xf32>
    %cst_93 = arith.constant 5.292500e-01 : f32
    %255 = vector.broadcast %cst_93 : f32 to vector<8x128xf32>
    %256 = arith.mulf %255, %210 : vector<8x128xf32>
    %257 = arith.addf %254, %256 : vector<8x128xf32>
    %cst_94 = arith.constant 0.199148268 : f32
    %258 = vector.broadcast %cst_94 : f32 to vector<8x128xf32>
    %259 = arith.mulf %258, %214 : vector<8x128xf32>
    %260 = arith.addf %257, %259 : vector<8x128xf32>
    %cst_95 = arith.constant 0.406005859 : f32
    %261 = vector.broadcast %cst_95 : f32 to vector<8x128xf32>
    %262 = arith.mulf %261, %215 : vector<8x128xf32>
    %263 = arith.addf %260, %262 : vector<8x128xf32>
    %cst_96 = arith.constant 0.735758901 : f32
    %264 = vector.broadcast %cst_96 : f32 to vector<8x128xf32>
    %265 = arith.mulf %264, %216 : vector<8x128xf32>
    %266 = arith.addf %263, %265 : vector<8x128xf32>
    %267 = arith.addf %266, %217 : vector<8x128xf32>
    %cst_97 = arith.constant 0.973500967 : f32
    %268 = vector.broadcast %cst_97 : f32 to vector<8x128xf32>
    %269 = arith.mulf %268, %207 : vector<8x128xf32>
    %270 = arith.addf %269, %208 : vector<8x128xf32>
    %cst_98 = arith.constant 0.963019073 : f32
    %271 = vector.broadcast %cst_98 : f32 to vector<8x128xf32>
    %272 = arith.mulf %271, %209 : vector<8x128xf32>
    %273 = arith.addf %270, %272 : vector<8x128xf32>
    %cst_99 = arith.constant 0.824360609 : f32
    %274 = vector.broadcast %cst_99 : f32 to vector<8x128xf32>
    %275 = arith.mulf %274, %210 : vector<8x128xf32>
    %276 = arith.addf %273, %275 : vector<8x128xf32>
    %cst_100 = arith.constant 5.292500e-01 : f32
    %277 = vector.broadcast %cst_100 : f32 to vector<8x128xf32>
    %278 = arith.mulf %277, %211 : vector<8x128xf32>
    %279 = arith.addf %276, %278 : vector<8x128xf32>
    %cst_101 = arith.constant 0.091578193 : f32
    %280 = vector.broadcast %cst_101 : f32 to vector<8x128xf32>
    %281 = arith.mulf %280, %214 : vector<8x128xf32>
    %282 = arith.addf %279, %281 : vector<8x128xf32>
    %cst_102 = arith.constant 0.199148268 : f32
    %283 = vector.broadcast %cst_102 : f32 to vector<8x128xf32>
    %284 = arith.mulf %283, %215 : vector<8x128xf32>
    %285 = arith.addf %282, %284 : vector<8x128xf32>
    %cst_103 = arith.constant 0.406005859 : f32
    %286 = vector.broadcast %cst_103 : f32 to vector<8x128xf32>
    %287 = arith.mulf %286, %216 : vector<8x128xf32>
    %288 = arith.addf %285, %287 : vector<8x128xf32>
    %cst_104 = arith.constant 0.735758901 : f32
    %289 = vector.broadcast %cst_104 : f32 to vector<8x128xf32>
    %290 = arith.mulf %289, %217 : vector<8x128xf32>
    %291 = arith.addf %288, %290 : vector<8x128xf32>
    %292 = arith.addf %291, %218 : vector<8x128xf32>
    %cst_105 = arith.constant 9.097960e-01 : f32
    %293 = vector.broadcast %cst_105 : f32 to vector<8x128xf32>
    %294 = arith.mulf %293, %207 : vector<8x128xf32>
    %cst_106 = arith.constant 0.973500967 : f32
    %295 = vector.broadcast %cst_106 : f32 to vector<8x128xf32>
    %296 = arith.mulf %295, %208 : vector<8x128xf32>
    %297 = arith.addf %294, %296 : vector<8x128xf32>
    %298 = arith.addf %297, %209 : vector<8x128xf32>
    %cst_107 = arith.constant 0.963019073 : f32
    %299 = vector.broadcast %cst_107 : f32 to vector<8x128xf32>
    %300 = arith.mulf %299, %210 : vector<8x128xf32>
    %301 = arith.addf %298, %300 : vector<8x128xf32>
    %cst_108 = arith.constant 0.824360609 : f32
    %302 = vector.broadcast %cst_108 : f32 to vector<8x128xf32>
    %303 = arith.mulf %302, %211 : vector<8x128xf32>
    %304 = arith.addf %301, %303 : vector<8x128xf32>
    %cst_109 = arith.constant 5.292500e-01 : f32
    %305 = vector.broadcast %cst_109 : f32 to vector<8x128xf32>
    %306 = arith.mulf %305, %212 : vector<8x128xf32>
    %307 = arith.addf %304, %306 : vector<8x128xf32>
    %cst_110 = arith.constant 0.0404276811 : f32
    %308 = vector.broadcast %cst_110 : f32 to vector<8x128xf32>
    %309 = arith.mulf %308, %214 : vector<8x128xf32>
    %310 = arith.addf %307, %309 : vector<8x128xf32>
    %cst_111 = arith.constant 0.091578193 : f32
    %311 = vector.broadcast %cst_111 : f32 to vector<8x128xf32>
    %312 = arith.mulf %311, %215 : vector<8x128xf32>
    %313 = arith.addf %310, %312 : vector<8x128xf32>
    %cst_112 = arith.constant 0.199148268 : f32
    %314 = vector.broadcast %cst_112 : f32 to vector<8x128xf32>
    %315 = arith.mulf %314, %216 : vector<8x128xf32>
    %316 = arith.addf %313, %315 : vector<8x128xf32>
    %cst_113 = arith.constant 0.406005859 : f32
    %317 = vector.broadcast %cst_113 : f32 to vector<8x128xf32>
    %318 = arith.mulf %317, %217 : vector<8x128xf32>
    %319 = arith.addf %316, %318 : vector<8x128xf32>
    %cst_114 = arith.constant 0.735758901 : f32
    %320 = vector.broadcast %cst_114 : f32 to vector<8x128xf32>
    %321 = arith.mulf %320, %218 : vector<8x128xf32>
    %322 = arith.addf %319, %321 : vector<8x128xf32>
    %323 = arith.addf %322, %219 : vector<8x128xf32>
    %cst_115 = arith.constant 0.82664144 : f32
    %324 = vector.broadcast %cst_115 : f32 to vector<8x128xf32>
    %325 = arith.mulf %324, %207 : vector<8x128xf32>
    %cst_116 = arith.constant 9.097960e-01 : f32
    %326 = vector.broadcast %cst_116 : f32 to vector<8x128xf32>
    %327 = arith.mulf %326, %208 : vector<8x128xf32>
    %328 = arith.addf %325, %327 : vector<8x128xf32>
    %cst_117 = arith.constant 0.973500967 : f32
    %329 = vector.broadcast %cst_117 : f32 to vector<8x128xf32>
    %330 = arith.mulf %329, %209 : vector<8x128xf32>
    %331 = arith.addf %328, %330 : vector<8x128xf32>
    %332 = arith.addf %331, %210 : vector<8x128xf32>
    %cst_118 = arith.constant 0.963019073 : f32
    %333 = vector.broadcast %cst_118 : f32 to vector<8x128xf32>
    %334 = arith.mulf %333, %211 : vector<8x128xf32>
    %335 = arith.addf %332, %334 : vector<8x128xf32>
    %cst_119 = arith.constant 0.824360609 : f32
    %336 = vector.broadcast %cst_119 : f32 to vector<8x128xf32>
    %337 = arith.mulf %336, %212 : vector<8x128xf32>
    %338 = arith.addf %335, %337 : vector<8x128xf32>
    %cst_120 = arith.constant 5.292500e-01 : f32
    %339 = vector.broadcast %cst_120 : f32 to vector<8x128xf32>
    %340 = arith.mulf %339, %213 : vector<8x128xf32>
    %341 = arith.addf %338, %340 : vector<8x128xf32>
    %cst_121 = arith.constant 0.017351266 : f32
    %342 = vector.broadcast %cst_121 : f32 to vector<8x128xf32>
    %343 = arith.mulf %342, %214 : vector<8x128xf32>
    %344 = arith.addf %341, %343 : vector<8x128xf32>
    %cst_122 = arith.constant 0.0404276811 : f32
    %345 = vector.broadcast %cst_122 : f32 to vector<8x128xf32>
    %346 = arith.mulf %345, %215 : vector<8x128xf32>
    %347 = arith.addf %344, %346 : vector<8x128xf32>
    %cst_123 = arith.constant 0.091578193 : f32
    %348 = vector.broadcast %cst_123 : f32 to vector<8x128xf32>
    %349 = arith.mulf %348, %216 : vector<8x128xf32>
    %350 = arith.addf %347, %349 : vector<8x128xf32>
    %cst_124 = arith.constant 0.199148268 : f32
    %351 = vector.broadcast %cst_124 : f32 to vector<8x128xf32>
    %352 = arith.mulf %351, %217 : vector<8x128xf32>
    %353 = arith.addf %350, %352 : vector<8x128xf32>
    %cst_125 = arith.constant 0.406005859 : f32
    %354 = vector.broadcast %cst_125 : f32 to vector<8x128xf32>
    %355 = arith.mulf %354, %218 : vector<8x128xf32>
    %356 = arith.addf %353, %355 : vector<8x128xf32>
    %cst_126 = arith.constant 0.735758901 : f32
    %357 = vector.broadcast %cst_126 : f32 to vector<8x128xf32>
    %358 = arith.mulf %357, %219 : vector<8x128xf32>
    %359 = arith.addf %356, %358 : vector<8x128xf32>
    %360 = arith.addf %359, %220 : vector<8x128xf32>
    %cst_127 = arith.constant 1.000000e+02 : f32
    %361 = vector.broadcast %cst_127 : f32 to vector<8x128xf32>
    %362 = arith.cmpf oge, %221, %361 : vector<8x128xf32>
    %363 = arith.extui %362 : vector<8x128xi1> to vector<8x128xi32>
    %364 = arith.sitofp %363 : vector<8x128xi32> to vector<8x128xf32>
    %c0_128 = arith.constant 0 : index
    %c0_129 = arith.constant 0 : index
    %365 = vector.load %arg6[%c0_128, %c0_129] : memref<8x1024xf32, #tpu.memory_space<vmem>>, vector<8x128xf32>
    tpu.vector_store %arg6[%c0_128, %c0_129], %364 {strides = array<i32>} : memref<8x1024xf32, #tpu.memory_space<vmem>>, vector<8x128xf32>,
    %cst_130 = arith.constant -5.292500e+01 : f32
    %366 = vector.broadcast %cst_130 : f32 to vector<8x128xf32>
    %367 = arith.mulf %366, %364 : vector<8x128xf32>
    %368 = arith.addf %224, %367 : vector<8x128xf32>
    %cst_131 = arith.constant -82.4360656 : f32
    %369 = vector.broadcast %cst_131 : f32 to vector<8x128xf32>
    %370 = arith.mulf %369, %364 : vector<8x128xf32>
    %371 = arith.addf %233, %370 : vector<8x128xf32>
    %cst_132 = arith.constant -9.630190e+01 : f32
    %372 = vector.broadcast %cst_132 : f32 to vector<8x128xf32>
    %373 = arith.mulf %372, %364 : vector<8x128xf32>
    %374 = arith.addf %248, %373 : vector<8x128xf32>
    %cst_133 = arith.constant -1.000000e+02 : f32
    %375 = vector.broadcast %cst_133 : f32 to vector<8x128xf32>
    %376 = arith.mulf %375, %364 : vector<8x128xf32>
    %377 = arith.addf %267, %376 : vector<8x128xf32>
    %cst_134 = arith.constant -97.3500976 : f32
    %378 = vector.broadcast %cst_134 : f32 to vector<8x128xf32>
    %379 = arith.mulf %378, %364 : vector<8x128xf32>
    %380 = arith.addf %292, %379 : vector<8x128xf32>
    %cst_135 = arith.constant -90.9795989 : f32
    %381 = vector.broadcast %cst_135 : f32 to vector<8x128xf32>
    %382 = arith.mulf %381, %364 : vector<8x128xf32>
    %383 = arith.addf %323, %382 : vector<8x128xf32>
    %cst_136 = arith.constant -82.6641464 : f32
    %384 = vector.broadcast %cst_136 : f32 to vector<8x128xf32>
    %385 = arith.mulf %384, %364 : vector<8x128xf32>
    %386 = arith.addf %360, %385 : vector<8x128xf32>
    %cst_137 = arith.constant 1.000000e+02 : f32
    %387 = vector.broadcast %cst_137 : f32 to vector<8x128xf32>
    %388 = arith.cmpf oge, %368, %387 : vector<8x128xf32>
    %389 = arith.extui %388 : vector<8x128xi1> to vector<8x128xi32>
    %390 = arith.sitofp %389 : vector<8x128xi32> to vector<8x128xf32>
    %c0_138 = arith.constant 0 : index
    %c128_139 = arith.constant 128 : index
    %391 = vector.load %arg6[%c0_138, %c128_139] : memref<8x1024xf32, #tpu.memory_space<vmem>>, vector<8x128xf32>
    tpu.vector_store %arg6[%c0_138, %c128_139], %390 {strides = array<i32>} : memref<8x1024xf32, #tpu.memory_space<vmem>>, vector<8x128xf32>,
    %cst_140 = arith.constant -5.292500e+01 : f32
    %392 = vector.broadcast %cst_140 : f32 to vector<8x128xf32>
    %393 = arith.mulf %392, %390 : vector<8x128xf32>
    %394 = arith.addf %371, %393 : vector<8x128xf32>
    %cst_141 = arith.constant -82.4360656 : f32
    %395 = vector.broadcast %cst_141 : f32 to vector<8x128xf32>
    %396 = arith.mulf %395, %390 : vector<8x128xf32>
    %397 = arith.addf %374, %396 : vector<8x128xf32>
    %cst_142 = arith.constant -9.630190e+01 : f32
    %398 = vector.broadcast %cst_142 : f32 to vector<8x128xf32>
    %399 = arith.mulf %398, %390 : vector<8x128xf32>
    %400 = arith.addf %377, %399 : vector<8x128xf32>
    %cst_143 = arith.constant -1.000000e+02 : f32
    %401 = vector.broadcast %cst_143 : f32 to vector<8x128xf32>
    %402 = arith.mulf %401, %390 : vector<8x128xf32>
    %403 = arith.addf %380, %402 : vector<8x128xf32>
    %cst_144 = arith.constant -97.3500976 : f32
    %404 = vector.broadcast %cst_144 : f32 to vector<8x128xf32>
    %405 = arith.mulf %404, %390 : vector<8x128xf32>
    %406 = arith.addf %383, %405 : vector<8x128xf32>
    %cst_145 = arith.constant -90.9795989 : f32
    %407 = vector.broadcast %cst_145 : f32 to vector<8x128xf32>
    %408 = arith.mulf %407, %390 : vector<8x128xf32>
    %409 = arith.addf %386, %408 : vector<8x128xf32>
    %cst_146 = arith.constant 1.000000e+02 : f32
    %410 = vector.broadcast %cst_146 : f32 to vector<8x128xf32>
    %411 = arith.cmpf oge, %394, %410 : vector<8x128xf32>
    %412 = arith.extui %411 : vector<8x128xi1> to vector<8x128xi32>
    %413 = arith.sitofp %412 : vector<8x128xi32> to vector<8x128xf32>
    %c0_147 = arith.constant 0 : index
    %c256_148 = arith.constant 256 : index
    %414 = vector.load %arg6[%c0_147, %c256_148] : memref<8x1024xf32, #tpu.memory_space<vmem>>, vector<8x128xf32>
    tpu.vector_store %arg6[%c0_147, %c256_148], %413 {strides = array<i32>} : memref<8x1024xf32, #tpu.memory_space<vmem>>, vector<8x128xf32>,
    %cst_149 = arith.constant -5.292500e+01 : f32
    %415 = vector.broadcast %cst_149 : f32 to vector<8x128xf32>
    %416 = arith.mulf %415, %413 : vector<8x128xf32>
    %417 = arith.addf %397, %416 : vector<8x128xf32>
    %cst_150 = arith.constant -82.4360656 : f32
    %418 = vector.broadcast %cst_150 : f32 to vector<8x128xf32>
    %419 = arith.mulf %418, %413 : vector<8x128xf32>
    %420 = arith.addf %400, %419 : vector<8x128xf32>
    %cst_151 = arith.constant -9.630190e+01 : f32
    %421 = vector.broadcast %cst_151 : f32 to vector<8x128xf32>
    %422 = arith.mulf %421, %413 : vector<8x128xf32>
    %423 = arith.addf %403, %422 : vector<8x128xf32>
    %cst_152 = arith.constant -1.000000e+02 : f32
    %424 = vector.broadcast %cst_152 : f32 to vector<8x128xf32>
    %425 = arith.mulf %424, %413 : vector<8x128xf32>
    %426 = arith.addf %406, %425 : vector<8x128xf32>
    %cst_153 = arith.constant -97.3500976 : f32
    %427 = vector.broadcast %cst_153 : f32 to vector<8x128xf32>
    %428 = arith.mulf %427, %413 : vector<8x128xf32>
    %429 = arith.addf %409, %428 : vector<8x128xf32>
    %cst_154 = arith.constant 1.000000e+02 : f32
    %430 = vector.broadcast %cst_154 : f32 to vector<8x128xf32>
    %431 = arith.cmpf oge, %417, %430 : vector<8x128xf32>
    %432 = arith.extui %431 : vector<8x128xi1> to vector<8x128xi32>
    %433 = arith.sitofp %432 : vector<8x128xi32> to vector<8x128xf32>
    %c0_155 = arith.constant 0 : index
    %c384_156 = arith.constant 384 : index
    %434 = vector.load %arg6[%c0_155, %c384_156] : memref<8x1024xf32, #tpu.memory_space<vmem>>, vector<8x128xf32>
    tpu.vector_store %arg6[%c0_155, %c384_156], %433 {strides = array<i32>} : memref<8x1024xf32, #tpu.memory_space<vmem>>, vector<8x128xf32>,
    %cst_157 = arith.constant -5.292500e+01 : f32
    %435 = vector.broadcast %cst_157 : f32 to vector<8x128xf32>
    %436 = arith.mulf %435, %433 : vector<8x128xf32>
    %437 = arith.addf %420, %436 : vector<8x128xf32>
    %cst_158 = arith.constant -82.4360656 : f32
    %438 = vector.broadcast %cst_158 : f32 to vector<8x128xf32>
    %439 = arith.mulf %438, %433 : vector<8x128xf32>
    %440 = arith.addf %423, %439 : vector<8x128xf32>
    %cst_159 = arith.constant -9.630190e+01 : f32
    %441 = vector.broadcast %cst_159 : f32 to vector<8x128xf32>
    %442 = arith.mulf %441, %433 : vector<8x128xf32>
    %443 = arith.addf %426, %442 : vector<8x128xf32>
    %cst_160 = arith.constant -1.000000e+02 : f32
    %444 = vector.broadcast %cst_160 : f32 to vector<8x128xf32>
    %445 = arith.mulf %444, %433 : vector<8x128xf32>
    %446 = arith.addf %429, %445 : vector<8x128xf32>
    %cst_161 = arith.constant 1.000000e+02 : f32
    %447 = vector.broadcast %cst_161 : f32 to vector<8x128xf32>
    %448 = arith.cmpf oge, %437, %447 : vector<8x128xf32>
    %449 = arith.extui %448 : vector<8x128xi1> to vector<8x128xi32>
    %450 = arith.sitofp %449 : vector<8x128xi32> to vector<8x128xf32>
    %c0_162 = arith.constant 0 : index
    %c512_163 = arith.constant 512 : index
    %451 = vector.load %arg6[%c0_162, %c512_163] : memref<8x1024xf32, #tpu.memory_space<vmem>>, vector<8x128xf32>
    tpu.vector_store %arg6[%c0_162, %c512_163], %450 {strides = array<i32>} : memref<8x1024xf32, #tpu.memory_space<vmem>>, vector<8x128xf32>,
    %cst_164 = arith.constant -5.292500e+01 : f32
    %452 = vector.broadcast %cst_164 : f32 to vector<8x128xf32>
    %453 = arith.mulf %452, %450 : vector<8x128xf32>
    %454 = arith.addf %440, %453 : vector<8x128xf32>
    %cst_165 = arith.constant -82.4360656 : f32
    %455 = vector.broadcast %cst_165 : f32 to vector<8x128xf32>
    %456 = arith.mulf %455, %450 : vector<8x128xf32>
    %457 = arith.addf %443, %456 : vector<8x128xf32>
    %cst_166 = arith.constant -9.630190e+01 : f32
    %458 = vector.broadcast %cst_166 : f32 to vector<8x128xf32>
    %459 = arith.mulf %458, %450 : vector<8x128xf32>
    %460 = arith.addf %446, %459 : vector<8x128xf32>
    %cst_167 = arith.constant 1.000000e+02 : f32
    %461 = vector.broadcast %cst_167 : f32 to vector<8x128xf32>
    %462 = arith.cmpf oge, %454, %461 : vector<8x128xf32>
    %463 = arith.extui %462 : vector<8x128xi1> to vector<8x128xi32>
    %464 = arith.sitofp %463 : vector<8x128xi32> to vector<8x128xf32>
    %c0_168 = arith.constant 0 : index
    %c640_169 = arith.constant 640 : index
    %465 = vector.load %arg6[%c0_168, %c640_169] : memref<8x1024xf32, #tpu.memory_space<vmem>>, vector<8x128xf32>
    tpu.vector_store %arg6[%c0_168, %c640_169], %464 {strides = array<i32>} : memref<8x1024xf32, #tpu.memory_space<vmem>>, vector<8x128xf32>,
    %cst_170 = arith.constant -5.292500e+01 : f32
    %466 = vector.broadcast %cst_170 : f32 to vector<8x128xf32>
    %467 = arith.mulf %466, %464 : vector<8x128xf32>
    %468 = arith.addf %457, %467 : vector<8x128xf32>
    %cst_171 = arith.constant -82.4360656 : f32
    %469 = vector.broadcast %cst_171 : f32 to vector<8x128xf32>
    %470 = arith.mulf %469, %464 : vector<8x128xf32>
    %471 = arith.addf %460, %470 : vector<8x128xf32>
    %cst_172 = arith.constant 1.000000e+02 : f32
    %472 = vector.broadcast %cst_172 : f32 to vector<8x128xf32>
    %473 = arith.cmpf oge, %468, %472 : vector<8x128xf32>
    %474 = arith.extui %473 : vector<8x128xi1> to vector<8x128xi32>
    %475 = arith.sitofp %474 : vector<8x128xi32> to vector<8x128xf32>
    %c0_173 = arith.constant 0 : index
    %c768_174 = arith.constant 768 : index
    %476 = vector.load %arg6[%c0_173, %c768_174] : memref<8x1024xf32, #tpu.memory_space<vmem>>, vector<8x128xf32>
    tpu.vector_store %arg6[%c0_173, %c768_174], %475 {strides = array<i32>} : memref<8x1024xf32, #tpu.memory_space<vmem>>, vector<8x128xf32>,
    %cst_175 = arith.constant -5.292500e+01 : f32
    %477 = vector.broadcast %cst_175 : f32 to vector<8x128xf32>
    %478 = arith.mulf %477, %475 : vector<8x128xf32>
    %479 = arith.addf %471, %478 : vector<8x128xf32>
    %cst_176 = arith.constant 1.000000e+02 : f32
    %480 = vector.broadcast %cst_176 : f32 to vector<8x128xf32>
    %481 = arith.cmpf oge, %479, %480 : vector<8x128xf32>
    %482 = arith.extui %481 : vector<8x128xi1> to vector<8x128xi32>
    %483 = arith.sitofp %482 : vector<8x128xi32> to vector<8x128xf32>
    %c0_177 = arith.constant 0 : index
    %c896_178 = arith.constant 896 : index
    %484 = vector.load %arg6[%c0_177, %c896_178] : memref<8x1024xf32, #tpu.memory_space<vmem>>, vector<8x128xf32>
    tpu.vector_store %arg6[%c0_177, %c896_178], %483 {strides = array<i32>} : memref<8x1024xf32, #tpu.memory_space<vmem>>, vector<8x128xf32>,
    return
  }
  func.func @transform_0(%arg0: i32) -> (i32, i32) {
    %c0_i32 = arith.constant 0 : i32
    %c0_i32_0 = arith.constant 0 : i32
    %c0_i32_1 = arith.constant 0 : i32
    return %c0_i32, %c0_i32_0 : i32, i32
  }
  func.func @transform_1(%arg0: i32) -> (i32, i32) {
    %c0_i32 = arith.constant 0 : i32
    %c0_i32_0 = arith.constant 0 : i32
    %c0_i32_1 = arith.constant 0 : i32
    return %c0_i32, %c0_i32_0 : i32, i32
  }
  func.func @transform_2(%arg0: i32) -> (i32, i32) {
    %c0_i32 = arith.constant 0 : i32
    %c0_i32_0 = arith.constant 0 : i32
    %c0_i32_1 = arith.constant 0 : i32
    return %c0_i32, %c0_i32_0 : i32, i32
  }
  func.func @transform_3(%arg0: i32) -> (i32, i32) {
    %c0_i32 = arith.constant 0 : i32
    %c0_i32_0 = arith.constant 0 : i32
    %c0_i32_1 = arith.constant 0 : i32
    return %c0_i32, %c0_i32_0 : i32, i32
  }
  func.func @transform_4(%arg0: i32) -> (i32, i32) {
    %c0_i32 = arith.constant 0 : i32
    %c0_i32_0 = arith.constant 0 : i32
    %c0_i32_1 = arith.constant 0 : i32
    return %c0_i32, %c0_i32_0 : i32, i32
  }
  func.func @transform_5(%arg0: i32) -> (i32, i32) {
    %c0_i32 = arith.constant 0 : i32
    %c0_i32_0 = arith.constant 0 : i32
    %c0_i32_1 = arith.constant 0 : i32
    return %c0_i32, %c0_i32_0 : i32, i32
  }
}

</mosaic_0001>

<bundles_post_ra>
// kernel: network_basic_forward.2
= control target key start
LH: loop header
LB: loop body
LE: loop exit
PB: predicated region body
PF: predicated region fallthrough
CT: control target
= control target key end

     0   :  { %vm189_vm0 = vcmask 523264   ;;  %s827_s1 = inlined_call_operand.vmem [shape: bf16[64,1024], index: 1, kind: input, shape index: {}]   ;;  %s828_s0 = inlined_call_operand.vmem [shape: bf16[8,64], index: 0, kind: input, shape index: {}]   ;;  %s829_s2 = inlined_call_operand.vmem [shape: bf16[8,1024], index: 2, kind: output, shape index: {}]  }
   0x1   :  { %v512_v0 = vld [vmem:[%s827_s1 + $0xc0] sm:$0xf]  ;;  %v573_v2 = vld [vmem:[%s827_s1 + $0xc4] sm:$0xf]  ;;  %v520_v5 = vld [vmem:[%s827_s1 + $0xc8] sm:$0xf] }
   0x2   :  { %v576_v1 = vld [vmem:[%s827_s1 + $0xdc] sm:$0xf0]  ;;  %v514_v4 = vld [vmem:[%s827_s1 + $0xe0] sm:$0xf0]  ;;  %v577_v6 = vld [vmem:[%s827_s1 + $0xe4] sm:$0xf0] }
   0x3   :  { %v513_v3 = vor.u32 %v576_v1, %v512_v0  ;;  %v517_v7 = vor.u32 %v573_v2, %v514_v4  ;;  %v521_v8 = vor.u32 %v577_v6, %v520_v5  ;;  %v574_v9 = vld [vmem:[%s827_s1 + $0xcc] sm:$0xf]  ;;  %v484_v11 = vld [vmem:[%s827_s1 + $0x80] sm:$0xf]  ;;  %v566_v14 = vld [vmem:[%s827_s1 + $0x84] sm:$0xf] }
   0x4   :  { %v522_v10 = vld [vmem:[%s827_s1 + $0xe8] sm:$0xf0]  ;;  %v569_v13 = vld [vmem:[%s827_s1 + $0x9c] sm:$0xf0]  ;;  %v486_v15 = vld [vmem:[%s827_s1 + $0xa0] sm:$0xf0] }
   0x5   :  { %197 = vmatpush.bf16.msra.mxu0 %v513_v3  ;;  %v525_v12 = vor.u32 %v574_v9, %v522_v10  ;;  %210 = vmatpush.bf16.msra.mxu1 %v517_v7  ;;  %v485_v16 = vor.u32 %v569_v13, %v484_v11  ;;  %v489_v17 = vor.u32 %v566_v14, %v486_v15  ;;  %v492_v18 = vld [vmem:[%s827_s1 + $0x88] sm:$0xf]  ;;  %v567_v20 = vld [vmem:[%s827_s1 + $0x8c] sm:$0xf]  ;;  %v456_v23 = vld [vmem:[%s827_s1 + $0x40] sm:$0xf] }
   0x6   :  { %223 = vmatpush.bf16.msra.mxu2 %v521_v8  ;;  %v570_v19 = vld [vmem:[%s827_s1 + $0xa4] sm:$0xf0]  ;;  %v494_v22 = vld [vmem:[%s827_s1 + $0xa8] sm:$0xf0]  ;;  %v562_v24 = vld [vmem:[%s827_s1 + $0x5c] sm:$0xf0] }
   0x7   :  { %236 = vmatpush.bf16.msra.mxu3 %v525_v12  ;;  %v493_v21 = vor.u32 %v570_v19, %v492_v18  ;;  %v497_v25 = vor.u32 %v567_v20, %v494_v22  ;;  %v559_v26 = vld [vmem:[%s827_s1 + $0x44] sm:$0xf]  ;;  %v464_v28 = vld [vmem:[%s827_s1 + $0x48] sm:$0xf]  ;;  %v457_v29 = vor.u32 %v562_v24, %v456_v23  ;;  %v560_v31 = vld [vmem:[%s827_s1 + $0x4c] sm:$0xf] }
   0x8   :  { %v458_v27 = vld [vmem:[%s827_s1 + $0x60] sm:$0xf0]  ;;  %v563_v30 = vld [vmem:[%s827_s1 + $0x64] sm:$0xf0]  ;;  %v466_v32 = vld [vmem:[%s827_s1 + $0x68] sm:$0xf0] }
   0x9   :  { %198 = vmatpush.bf16.msra.mxu0 %v485_v16  ;;  %211 = vmatpush.bf16.msra.mxu1 %v489_v17  ;;  %v461_v33 = vor.u32 %v559_v26, %v458_v27  ;;  %v465_v34 = vor.u32 %v563_v30, %v464_v28  ;;  %v428_v35 = vld [vmem:[%s827_s1] sm:$0xf]  ;;  %v552_v37 = vld [vmem:[%s827_s1 + $0x4] sm:$0xf]  ;;  %v469_v38 = vor.u32 %v560_v31, %v466_v32  ;;  %v436_v40 = vld [vmem:[%s827_s1 + $0x8] sm:$0xf] }
   0xa   :  { %224 = vmatpush.bf16.msra.mxu2 %v493_v21  ;;  %v555_v36 = vld [vmem:[%s827_s1 + $0x1c] sm:$0xf0]  ;;  %v430_v39 = vld [vmem:[%s827_s1 + $0x20] sm:$0xf0]  ;;  %v556_v41 = vld [vmem:[%s827_s1 + $0x24] sm:$0xf0] }
   0xb   :  { %237 = vmatpush.bf16.msra.mxu3 %v497_v25  ;;  %v553_v42 = vld [vmem:[%s827_s1 + $0xc] sm:$0xf]  ;;  %v429_v44 = vor.u32 %v555_v36, %v428_v35  ;;  %v528_v45 = vld [vmem:[%s827_s1 + $0xd0] sm:$0xf]  ;;  %v575_v47 = vld [vmem:[%s827_s1 + $0xd4] sm:$0xf]  ;;  %v433_v48 = vor.u32 %v552_v37, %v430_v39  ;;  %v437_v49 = vor.u32 %v556_v41, %v436_v40 }
   0xc   :  { %v438_v43 = vld [vmem:[%s827_s1 + $0x28] sm:$0xf0]  ;;  %v578_v46 = vld [vmem:[%s827_s1 + $0xec] sm:$0xf0]  ;;  %v530_v50 = vld [vmem:[%s827_s1 + $0xf0] sm:$0xf0] }
   0xd   :  { %199 = vmatpush.bf16.msra.mxu0 %v457_v29  ;;  %212 = vmatpush.bf16.msra.mxu1 %v461_v33  ;;  %v441_v51 = vor.u32 %v553_v42, %v438_v43  ;;  %v529_v52 = vor.u32 %v578_v46, %v528_v45  ;;  %v536_v53 = vld [vmem:[%s827_s1 + $0xd8] sm:$0xf]  ;;  %v533_v55 = vor.u32 %v575_v47, %v530_v50  ;;  %v500_v56 = vld [vmem:[%s827_s1 + $0x90] sm:$0xf]  ;;  %v12_v58 = vld [vmem:[%s828_s0] sm:$0xf] }
   0xe   :  { %225 = vmatpush.bf16.msra.mxu2 %v465_v34  ;;  %v579_v54 = vld [vmem:[%s827_s1 + $0xf4] sm:$0xf0]  ;;  %v571_v57 = vld [vmem:[%s827_s1 + $0xac] sm:$0xf0]  ;;  %v568_v59 = vld [vmem:[%s827_s1 + $0x94] sm:$0xf] }
   0xf   :  { %238 = vmatpush.bf16.msra.mxu3 %v469_v38  ;;  %v502_v60 = vld [vmem:[%s827_s1 + $0xb0] sm:$0xf0]  ;;  %v537_v61 = vor.u32 %v579_v54, %v536_v53  ;;  %v501_v62 = vor.u32 %v571_v57, %v500_v56  ;;  %v508_v63 = vld [vmem:[%s827_s1 + $0x98] sm:$0xf]  ;;  %v472_v2 = vld [vmem:[%s827_s1 + $0x50] sm:$0xf] }
  0x10   :  { %v572_v0 = vld [vmem:[%s827_s1 + $0xb4] sm:$0xf0]  ;;  %v505_v1 = vor.u32 %v568_v59, %v502_v60  ;;  %v564_v3 = vld [vmem:[%s827_s1 + $0x6c] sm:$0xf0]  ;;  %v561_v4 = vld [vmem:[%s827_s1 + $0x54] sm:$0xf] }
  0x11   :  { %200 = vmatpush.bf16.msra.mxu0 %v429_v44  ;;  %213 = vmatpush.bf16.msra.mxu1 %v433_v48  ;;  %v474_v5 = vld [vmem:[%s827_s1 + $0x70] sm:$0xf0]  ;;  %v509_v6 = vor.u32 %v572_v0, %v508_v63  ;;  %v473_v7 = vor.u32 %v564_v3, %v472_v2  ;;  %v480_v8 = vld [vmem:[%s827_s1 + $0x58] sm:$0xf]  ;;  %v444_v11 = vld [vmem:[%s827_s1 + $0x10] sm:$0xf] }
  0x12   :  { %226 = vmatpush.bf16.msra.mxu2 %v437_v49  ;;  %v565_v9 = vld [vmem:[%s827_s1 + $0x74] sm:$0xf0]  ;;  %v477_v10 = vor.u32 %v561_v4, %v474_v5  ;;  %v557_v12 = vld [vmem:[%s827_s1 + $0x2c] sm:$0xf0]  ;;  %v554_v13 = vld [vmem:[%s827_s1 + $0x14] sm:$0xf] }
  0x13   :  { %239 = vmatpush.bf16.msra.mxu3 %v441_v51  ;;  %v446_v14 = vld [vmem:[%s827_s1 + $0x30] sm:$0xf0]  ;;  %v481_v15 = vor.u32 %v565_v9, %v480_v8  ;;  %v445_v16 = vor.u32 %v557_v12, %v444_v11  ;;  %v452_v17 = vld [vmem:[%s827_s1 + $0x18] sm:$0xf]  ;;  %v586_v21 = vmov 0.0|0.0   ;;  %v587_v26 = vmov 0.0  }
  0x14   :  { %538 = vmatmul.msk.bf16.vlgmr.msra.gmra.mxu0 %vm189_vm0, %v12_v58  ;;  %539 = vmatmul.msk.bf16.vlgmr.msra.gmra.mxu1 %vm189_vm0, %v12_v58  ;;  %v558_v18 = vld [vmem:[%s827_s1 + $0x34] sm:$0xf0]  ;;  %v449_v19 = vor.u32 %v554_v13, %v446_v14  ;;  %v581_v22 = vunpack.c.l.bf16 %v586_v21 }
  0x15   :  { %249 = vmatpush.bf16.msrb.mxu0 %v529_v52  ;;  %262 = vmatpush.bf16.msrb.mxu1 %v533_v55  ;;  %v453_v20 = vor.u32 %v558_v18, %v452_v17 }
  0x16   :  { %540 = vmatmul.msk.bf16.vlgmr.msra.gmra.mxu2 %vm189_vm0, %v12_v58  ;;  %541 = vmatmul.msk.bf16.vlgmr.msra.gmra.mxu3 %vm189_vm0, %v12_v58 }
  0x17   :  { %275 = vmatpush.bf16.msrb.mxu2 %v537_v61 }
  0x19   :  { %250 = vmatpush.bf16.msrb.mxu0 %v501_v62  ;;  %263 = vmatpush.bf16.msrb.mxu1 %v505_v1 }
  0x1b   :  { %276 = vmatpush.bf16.msrb.mxu2 %v509_v6 }
  0x1d   :  { %251 = vmatpush.bf16.msrb.mxu0 %v473_v7  ;;  %264 = vmatpush.bf16.msrb.mxu1 %v477_v10 }
  0x1f   :  { %277 = vmatpush.bf16.msrb.mxu2 %v481_v15 }
  0x21   :  { %252 = vmatpush.bf16.msrb.mxu0 %v445_v16  ;;  %265 = vmatpush.bf16.msrb.mxu1 %v449_v19 }
  0x23   :  { %278 = vmatpush.bf16.msrb.mxu2 %v453_v20 }
  0x24   :  { %542 = vmatmul.msk.bf16.vlgmr.msrb.gmra.mxu0 %vm189_vm0, %v12_v58  ;;  %543 = vmatmul.msk.bf16.vlgmr.msrb.gmra.mxu1 %vm189_vm0, %v12_v58 }
  0x26   :  { %544 = vmatmul.msk.bf16.vlgmr.msrb.gmra.mxu2 %vm189_vm0, %v12_v58 }
  0x91   :  { %v202_v23 = vpop.f32.mrf.mxu0  ;;  %v215_v24 = vpop.f32.mrf.mxu1 }
  0x92   :  { %vm345_vm1 = vcmp.ge.f32.partialorder %v202_v23, 30.0  ;;  %v284_v25 = vmul.f32 0.7357589, %v202_v23  ;;  %v287_v28 = vmul.f32 0.7357589, %v215_v24  ;;  %v286_v29 = vmul.f32 0.40600586, %v202_v23 }
  0x93   :  { %v782_v27 = vsel %vm345_vm1, 1.0, %v587_v26  ;;  %v290_v30 = vmul.f32 0.19914827, %v202_v23  ;;  %v291_v34 = vmul.f32 0.40600586, %v215_v24  ;;  %v296_v36 = vmul.f32 0.09157819, %v202_v23 }
  0x94   :  { %v582_v31 = vpack.c.bf16 %v782_v27, %v581_v22  ;;  %v285_v32 = vadd.f32 %v284_v25, %v215_v24  ;;  %v350_v33 = vmul.f32 -30.0, %v782_v27  ;;  %v297_v37 = vmul.f32 0.19914827, %v215_v24 }
  0x95   :  { %v315_v38 = vmul.f32 0.04042768, %v215_v24  ;;  %v288_v39 = vadd.f32 %v287_v28, %v286_v29  ;;  %v352_v40 = vmul.f32 -22.072767, %v782_v27  ;;  %v304_v41 = vmul.f32 0.04042768, %v202_v23 }
  0x96   :  { %583 = vst [vmem:[%s829_s2] sm:$0xff] %v582_v31   ;;  %v351_v35 = vadd.f32 %v350_v33, %v285_v32  ;;  %v292_v43 = vadd.f32 %v291_v34, %v290_v30  ;;  %v305_v44 = vmul.f32 0.09157819, %v215_v24  ;;  %v314_v45 = vmul.f32 0.017351266, %v202_v23 }
  0x97   :  { %v298_v56 = vadd.f32 %v297_v37, %v296_v36  ;;  %v354_v1 = vmul.f32 -12.180176, %v782_v27  ;;  %v356_v17 = vmul.f32 -5.974448, %v782_v27  ;;  %v358_v31 = vmul.f32 -2.747346, %v782_v27 }
  0x98   :  { %vm362_vm2 = vcmp.ge.f32.partialorder %v351_v35, 30.0  ;;  %v306_v62 = vadd.f32 %v305_v44, %v304_v41  ;;  %v316_v4 = vadd.f32 %v315_v38, %v314_v45  ;;  %v360_v45 = vmul.f32 -1.2128304, %v782_v27 }
  0x99   :  { %v228_v42 = vpop.f32.mrf.mxu2  ;;  %v791_v46 = vsel %vm362_vm2, 1.0, %v587_v26  ;;  %v241_v50 = vpop.f32.mrf.mxu3 }
  0x9a   :  { %v289_v47 = vadd.f32 %v288_v39, %v228_v42  ;;  %v293_v48 = vmul.f32 0.7357589, %v228_v42  ;;  %v299_v49 = vmul.f32 0.40600586, %v228_v42  ;;  %v204_v51 = vpop.f32.mrf.mxu0  ;;  %v365_v52 = vpack.c.bf16 %v791_v46, %v791_v46  ;;  %v217_v55 = vpop.f32.mrf.mxu1 }
  0x9b   :  { %v307_v53 = vmul.f32 0.19914827, %v228_v42  ;;  %v367_v54 = vmul.f32 -30.0, %v791_v46  ;;  %v317_v59 = vmul.f32 0.09157819, %v228_v42  ;;  %v309_v2 = vmul.f32 0.40600586, %v241_v50 }
  0x9c   :  { %v353_v57 = vadd.f32 %v352_v40, %v289_v47  ;;  %v294_v58 = vadd.f32 %v293_v48, %v292_v43  ;;  %366 = vst [vmem:[%s829_s2 + $0x8] sm:$0xf] %v365_v52  ;;  %v301_v60 = vmul.f32 0.7357589, %v241_v50  ;;  %v300_v61 = vadd.f32 %v299_v49, %v298_v56 }
  0x9d   :  { %v308_v3 = vadd.f32 %v307_v53, %v306_v62  ;;  %v319_v5 = vmul.f32 0.19914827, %v241_v50  ;;  %v369_v7 = vmul.f32 -22.072767, %v791_v46  ;;  %v318_v11 = vadd.f32 %v317_v59, %v316_v4 }
  0x9e   :  { %v368_v63 = vadd.f32 %v367_v54, %v353_v57  ;;  %v295_v0 = vadd.f32 %v294_v58, %v241_v50  ;;  %v302_v10 = vadd.f32 %v301_v60, %v300_v61  ;;  %v371_v29 = vmul.f32 -12.180176, %v791_v46 }
  0x9f   :  { %v310_v22 = vadd.f32 %v309_v2, %v308_v3  ;;  %v320_v25 = vadd.f32 %v319_v5, %v318_v11  ;;  %v373_v42 = vmul.f32 -5.974448, %v791_v46  ;;  %v375_v53 = vmul.f32 -2.747346, %v791_v46 }
  0xa0   :  { %vm377_vm3 = vcmp.ge.f32.partialorder %v368_v63, 30.0  ;;  %v355_v6 = vadd.f32 %v354_v1, %v295_v0 }
  0xa1   :  { %v547_v8 = vsel %vm377_vm3, 1.0, %v587_v26  ;;  %v230_v9 = vpop.f32.mrf.mxu2  ;;  %v243_v15 = vpop.f32.mrf.mxu3 }
  0xa2   :  { %v380_v12 = vpack.c.bf16 %v547_v8, %v547_v8  ;;  %v370_v13 = vadd.f32 %v369_v7, %v355_v6  ;;  %v382_v14 = vmul.f32 -30.0, %v547_v8  ;;  %v254_v16 = vpop.f32.mrf.mxu0  ;;  %v267_v21 = vpop.f32.mrf.mxu1  ;;  %v384_v35 = vmul.f32 -22.072767, %v547_v8 }
  0xa3   :  { %v303_v18 = vadd.f32 %v302_v10, %v254_v16  ;;  %v311_v19 = vmul.f32 0.7357589, %v254_v16  ;;  %v321_v20 = vmul.f32 0.40600586, %v254_v16  ;;  %v323_v24 = vmul.f32 0.7357589, %v267_v21 }
  0xa4   :  { %381 = vst [vmem:[%s829_s2 + $0xc] sm:$0xf] %v380_v12  ;;  %v383_v23 = vadd.f32 %v382_v14, %v370_v13  ;;  %v386_v50 = vmul.f32 -12.180176, %v547_v8  ;;  %v388_v58 = vmul.f32 -5.974448, %v547_v8 }
  0xa5   :  { %v357_v28 = vadd.f32 %v356_v17, %v303_v18  ;;  %v312_v30 = vadd.f32 %v311_v19, %v310_v22  ;;  %v322_v32 = vadd.f32 %v321_v20, %v320_v25 }
  0xa6   :  { %vm390_vm4 = vcmp.ge.f32.partialorder %v383_v23, 30.0 }
  0xa7   :  { %v548_v33 = vsel %vm390_vm4, 1.0, %v587_v26  ;;  %v372_v34 = vadd.f32 %v371_v29, %v357_v28  ;;  %v313_v36 = vadd.f32 %v312_v30, %v267_v21  ;;  %v324_v38 = vadd.f32 %v323_v24, %v322_v32 }
  0xa8   :  { %v393_v37 = vpack.c.bf16 %v548_v33, %v548_v33  ;;  %v395_v40 = vmul.f32 -30.0, %v548_v33  ;;  %v397_v55 = vmul.f32 -22.072767, %v548_v33  ;;  %v399_v27 = vmul.f32 -12.180176, %v548_v33 }
  0xa9   :  { %v385_v39 = vadd.f32 %v384_v35, %v372_v34  ;;  %v359_v41 = vadd.f32 %v358_v31, %v313_v36  ;;  %v280_v43 = vpop.f32.mrf.mxu2 }
  0xaa   :  { %394 = vst [vmem:[%s829_s2 + $0x10] sm:$0xf] %v393_v37  ;;  %v325_v44 = vadd.f32 %v324_v38, %v280_v43  ;;  %v256_v47 = vpop.f32.mrf.mxu0  ;;  %v269_v51 = vpop.f32.mrf.mxu1 }
  0xab   :  { %v396_v48 = vadd.f32 %v395_v40, %v385_v39  ;;  %v374_v49 = vadd.f32 %v373_v42, %v359_v41 }
  0xac   :  { %v361_v52 = vadd.f32 %v360_v45, %v325_v44 }
  0xad   :  { %vm401_vm5 = vcmp.ge.f32.partialorder %v396_v48, 30.0  ;;  %v387_v54 = vadd.f32 %v386_v50, %v374_v49 }
  0xae   :  { %v549_v56 = vsel %vm401_vm5, 1.0, %v587_v26  ;;  %v376_v57 = vadd.f32 %v375_v53, %v361_v52 }
  0xaf   :  { %v404_v59 = vpack.c.bf16 %v549_v56, %v549_v56  ;;  %v398_v60 = vadd.f32 %v397_v55, %v387_v54  ;;  %v406_v61 = vmul.f32 -30.0, %v549_v56  ;;  %v408_v46 = vmul.f32 -22.072767, %v549_v56 }
  0xb0   :  { %v389_v62 = vadd.f32 %v388_v58, %v376_v57 }
  0xb1   :  { %405 = vst [vmem:[%s829_s2 + $0x14] sm:$0xf] %v404_v59  ;;  %v407_v63 = vadd.f32 %v406_v61, %v398_v60  ;;  %v282_v0 = vpop.f32.mrf.mxu2 }
  0xb2   :  { %v400_v1 = vadd.f32 %v399_v27, %v389_v62 }
  0xb3   :  { %vm410_vm6 = vcmp.ge.f32.partialorder %v407_v63, 30.0 }
  0xb4   :  { %v550_v2 = vsel %vm410_vm6, 1.0, %v587_v26  ;;  %v409_v5 = vadd.f32 %v408_v46, %v400_v1 }
  0xb5   :  { %v413_v3 = vpack.c.bf16 %v550_v2, %v550_v2  ;;  %v415_v4 = vmul.f32 -30.0, %v550_v2 }
  0xb7   :  { %414 = vst [vmem:[%s829_s2 + $0x18] sm:$0xf] %v413_v3  ;;  %v416_v6 = vadd.f32 %v415_v4, %v409_v5 }
  0xb9   :  { %vm417_vm7 = vcmp.ge.f32.partialorder %v416_v6, 30.0 }
  0xba   :  { %v551_v7 = vsel %vm417_vm7, 1.0, %v587_v26 }
  0xbb   :  { %v420_v8 = vpack.c.bf16 %v551_v7, %v551_v7 }
  0xbd   :  { %421 = vst [vmem:[%s829_s2 + $0x1c] sm:$0xf] %v420_v8 }

// kernel: network_basic_forward.3
= control target key start
LH: loop header
LB: loop body
LE: loop exit
PB: predicated region body
PF: predicated region fallthrough
CT: control target
= control target key end

     0   :  { %vm242_vm0 = vcmask 654336   ;;  %vm483_vm1 = vcmask 64512   ;;  %vm487_vm3 = vcmask 1043456   ;;  %vm689_vm8 = vcmask 261120   ;;  %s1696_s1 = inlined_call_operand.vmem [shape: bf16[80,1024], index: 1, kind: input, shape index: {}]   ;;  %s1697_s0 = inlined_call_operand.vmem [shape: bf16[8,80], index: 0, kind: input, shape index: {}]   ;;  %s1698_s2 = inlined_call_operand.vmem [shape: bf16[8,8], index: 2, kind: input, shape index: {}]   ;;  %s1699_s4 = inlined_call_operand.vmem [shape: bf16[32,1024], index: 4, kind: input, shape index: {}]   ;;  %s1700_s3 = inlined_call_operand.vmem [shape: bf16[8,32], index: 3, kind: input, shape index: {}]   ;;  %s1701_s5 = inlined_call_operand.vmem [shape: f32[8,1024], index: 5, kind: output, shape index: {}]  }
   0x1   :  { %v1084_v0 = vld [vmem:[%s1696_s1 + $0x100] sm:$0xf]  ;;  %v1229_v2 = vld [vmem:[%s1696_s1 + $0x104] sm:$0xf]  ;;  %v1092_v5 = vld [vmem:[%s1696_s1 + $0x108] sm:$0xf] }
   0x2   :  { %v1232_v1 = vld [vmem:[%s1696_s1 + $0x11c] sm:$0xf0]  ;;  %v1086_v4 = vld [vmem:[%s1696_s1 + $0x120] sm:$0xf0]  ;;  %v1233_v6 = vld [vmem:[%s1696_s1 + $0x124] sm:$0xf0] }
   0x3   :  { %v1085_v3 = vor.u32 %v1232_v1, %v1084_v0  ;;  %v1089_v7 = vor.u32 %v1229_v2, %v1086_v4  ;;  %v1093_v8 = vor.u32 %v1233_v6, %v1092_v5  ;;  %v1230_v9 = vld [vmem:[%s1696_s1 + $0x10c] sm:$0xf]  ;;  %v1056_v11 = vld [vmem:[%s1696_s1 + $0xc0] sm:$0xf]  ;;  %v1222_v14 = vld [vmem:[%s1696_s1 + $0xc4] sm:$0xf] }
   0x4   :  { %v1094_v10 = vld [vmem:[%s1696_s1 + $0x128] sm:$0xf0]  ;;  %v1225_v13 = vld [vmem:[%s1696_s1 + $0xdc] sm:$0xf0]  ;;  %v1058_v15 = vld [vmem:[%s1696_s1 + $0xe0] sm:$0xf0] }
   0x5   :  { %249 = vmatpush.bf16.msra.mxu0 %v1085_v3  ;;  %v1097_v12 = vor.u32 %v1230_v9, %v1094_v10  ;;  %262 = vmatpush.bf16.msra.mxu1 %v1089_v7  ;;  %v1057_v16 = vor.u32 %v1225_v13, %v1056_v11  ;;  %v1061_v17 = vor.u32 %v1222_v14, %v1058_v15  ;;  %v1064_v18 = vld [vmem:[%s1696_s1 + $0xc8] sm:$0xf]  ;;  %v1223_v20 = vld [vmem:[%s1696_s1 + $0xcc] sm:$0xf]  ;;  %v1028_v23 = vld [vmem:[%s1696_s1 + $0x80] sm:$0xf] }
   0x6   :  { %275 = vmatpush.bf16.msra.mxu2 %v1093_v8  ;;  %v1226_v19 = vld [vmem:[%s1696_s1 + $0xe4] sm:$0xf0]  ;;  %v1066_v22 = vld [vmem:[%s1696_s1 + $0xe8] sm:$0xf0]  ;;  %v1218_v24 = vld [vmem:[%s1696_s1 + $0x9c] sm:$0xf0] }
   0x7   :  { %288 = vmatpush.bf16.msra.mxu3 %v1097_v12  ;;  %v1065_v21 = vor.u32 %v1226_v19, %v1064_v18  ;;  %v1069_v25 = vor.u32 %v1223_v20, %v1066_v22  ;;  %v1215_v26 = vld [vmem:[%s1696_s1 + $0x84] sm:$0xf]  ;;  %v1036_v28 = vld [vmem:[%s1696_s1 + $0x88] sm:$0xf]  ;;  %v1029_v29 = vor.u32 %v1218_v24, %v1028_v23  ;;  %v1216_v31 = vld [vmem:[%s1696_s1 + $0x8c] sm:$0xf] }
   0x8   :  { %v1030_v27 = vld [vmem:[%s1696_s1 + $0xa0] sm:$0xf0]  ;;  %v1219_v30 = vld [vmem:[%s1696_s1 + $0xa4] sm:$0xf0]  ;;  %v1038_v32 = vld [vmem:[%s1696_s1 + $0xa8] sm:$0xf0] }
   0x9   :  { %250 = vmatpush.bf16.msra.mxu0 %v1057_v16  ;;  %263 = vmatpush.bf16.msra.mxu1 %v1061_v17  ;;  %v1033_v33 = vor.u32 %v1215_v26, %v1030_v27  ;;  %v1037_v34 = vor.u32 %v1219_v30, %v1036_v28  ;;  %v1000_v35 = vld [vmem:[%s1696_s1 + $0x40] sm:$0xf]  ;;  %v1208_v37 = vld [vmem:[%s1696_s1 + $0x44] sm:$0xf]  ;;  %v1041_v38 = vor.u32 %v1216_v31, %v1038_v32  ;;  %v1008_v40 = vld [vmem:[%s1696_s1 + $0x48] sm:$0xf] }
   0xa   :  { %276 = vmatpush.bf16.msra.mxu2 %v1065_v21  ;;  %v1211_v36 = vld [vmem:[%s1696_s1 + $0x5c] sm:$0xf0]  ;;  %v1002_v39 = vld [vmem:[%s1696_s1 + $0x60] sm:$0xf0]  ;;  %v1212_v41 = vld [vmem:[%s1696_s1 + $0x64] sm:$0xf0] }
   0xb   :  { %289 = vmatpush.bf16.msra.mxu3 %v1069_v25  ;;  %v1209_v42 = vld [vmem:[%s1696_s1 + $0x4c] sm:$0xf]  ;;  %v1001_v44 = vor.u32 %v1211_v36, %v1000_v35  ;;  %v972_v45 = vld [vmem:[%s1696_s1] sm:$0xf]  ;;  %v1005_v46 = vor.u32 %v1208_v37, %v1002_v39  ;;  %v1009_v47 = vor.u32 %v1212_v41, %v1008_v40  ;;  %v1201_v49 = vld [vmem:[%s1696_s1 + $0x4] sm:$0xf] }
   0xc   :  { %v1010_v43 = vld [vmem:[%s1696_s1 + $0x68] sm:$0xf0]  ;;  %v1204_v48 = vld [vmem:[%s1696_s1 + $0x1c] sm:$0xf0]  ;;  %v974_v50 = vld [vmem:[%s1696_s1 + $0x20] sm:$0xf0] }
   0xd   :  { %251 = vmatpush.bf16.msra.mxu0 %v1029_v29  ;;  %264 = vmatpush.bf16.msra.mxu1 %v1033_v33  ;;  %v1013_v51 = vor.u32 %v1209_v42, %v1010_v43  ;;  %v980_v52 = vld [vmem:[%s1696_s1 + $0x8] sm:$0xf]  ;;  %v1202_v54 = vld [vmem:[%s1696_s1 + $0xc] sm:$0xf]  ;;  %v1100_v56 = vld [vmem:[%s1696_s1 + $0x110] sm:$0xf]  ;;  %v973_v58 = vor.u32 %v1204_v48, %v972_v45  ;;  %v977_v61 = vor.u32 %v1201_v49, %v974_v50 }
   0xe   :  { %277 = vmatpush.bf16.msra.mxu2 %v1037_v34  ;;  %v1205_v53 = vld [vmem:[%s1696_s1 + $0x24] sm:$0xf0]  ;;  %v982_v55 = vld [vmem:[%s1696_s1 + $0x28] sm:$0xf0]  ;;  %v1234_v57 = vld [vmem:[%s1696_s1 + $0x12c] sm:$0xf0] }
   0xf   :  { %290 = vmatpush.bf16.msra.mxu3 %v1041_v38  ;;  %v1231_v59 = vld [vmem:[%s1696_s1 + $0x114] sm:$0xf]  ;;  %v981_v62 = vor.u32 %v1205_v53, %v980_v52  ;;  %v985_v63 = vor.u32 %v1202_v54, %v982_v55  ;;  %v1101_v0 = vor.u32 %v1234_v57, %v1100_v56  ;;  %v1072_v2 = vld [vmem:[%s1696_s1 + $0xd0] sm:$0xf]  ;;  %v1425_v4 = vld [vmem:[%s1697_s0] sm:$0xf] }
  0x10   :  { %v1102_v60 = vld [vmem:[%s1696_s1 + $0x130] sm:$0xf0]  ;;  %v1227_v3 = vld [vmem:[%s1696_s1 + $0xec] sm:$0xf0]  ;;  %v1108_v7 = vld [vmem:[%s1696_s1 + $0x118] sm:$0xf] }
  0x11   :  { %252 = vmatpush.bf16.msra.mxu0 %v1001_v44  ;;  %265 = vmatpush.bf16.msra.mxu1 %v1005_v46  ;;  %v1105_v1 = vor.u32 %v1231_v59, %v1102_v60  ;;  %v1224_v5 = vld [vmem:[%s1696_s1 + $0xd4] sm:$0xf]  ;;  %v1235_v8 = vld [vmem:[%s1696_s1 + $0x134] sm:$0xf0]  ;;  %v1073_v9 = vor.u32 %v1227_v3, %v1072_v2  ;;  %v1044_v14 = vld [vmem:[%s1696_s1 + $0x90] sm:$0xf] }
  0x12   :  { %278 = vmatpush.bf16.msra.mxu2 %v1009_v47  ;;  %v1074_v6 = vld [vmem:[%s1696_s1 + $0xf0] sm:$0xf0]  ;;  %v1109_v10 = vor.u32 %v1235_v8, %v1108_v7  ;;  %v1080_v11 = vld [vmem:[%s1696_s1 + $0xd8] sm:$0xf]  ;;  %v1220_v15 = vld [vmem:[%s1696_s1 + $0xac] sm:$0xf0] }
  0x13   :  { %291 = vmatpush.bf16.msra.mxu3 %v1013_v51  ;;  %v1228_v12 = vld [vmem:[%s1696_s1 + $0xf4] sm:$0xf0]  ;;  %v1077_v13 = vor.u32 %v1224_v5, %v1074_v6  ;;  %v1217_v16 = vld [vmem:[%s1696_s1 + $0x94] sm:$0xf]  ;;  %v1045_v19 = vor.u32 %v1220_v15, %v1044_v14  ;;  %v1252_v20 = vmov 0.0|0.0   ;;  %v1253_v50 = vmov 0.0  }
  0x14   :  { %v1046_v17 = vld [vmem:[%s1696_s1 + $0xb0] sm:$0xf0]  ;;  %v1081_v18 = vor.u32 %v1228_v12, %v1080_v11  ;;  %v1016_v22 = vld [vmem:[%s1696_s1 + $0x50] sm:$0xf]  ;;  %v1496_v34 = vld [vmem:[%s1698_s2] sm:$0xf]  ;;  %881 = vst [vmem:[%s1701_s5] sm:$0xff] %v1253_v50 }
  0x15   :  { %253 = vmatpush.bf16.msra.mxu0 %v973_v58  ;;  %266 = vmatpush.bf16.msra.mxu1 %v977_v61  ;;  %v1049_v21 = vor.u32 %v1217_v16, %v1046_v17  ;;  %v1213_v23 = vld [vmem:[%s1696_s1 + $0x6c] sm:$0xf0]  ;;  %v1210_v24 = vld [vmem:[%s1696_s1 + $0x54] sm:$0xf]  ;;  %v1052_v35 = vld [vmem:[%s1696_s1 + $0x98] sm:$0xf] }
  0x16   :  { %279 = vmatpush.bf16.msra.mxu2 %v981_v62  ;;  %v1018_v25 = vld [vmem:[%s1696_s1 + $0x70] sm:$0xf0]  ;;  %v1017_v26 = vor.u32 %v1213_v23, %v1016_v22  ;;  %v988_v28 = vld [vmem:[%s1696_s1 + $0x10] sm:$0xf]  ;;  %v1221_v36 = vld [vmem:[%s1696_s1 + $0xb4] sm:$0xf0] }
  0x17   :  { %292 = vmatpush.bf16.msra.mxu3 %v985_v63  ;;  %v1021_v27 = vor.u32 %v1210_v24, %v1018_v25  ;;  %v1206_v29 = vld [vmem:[%s1696_s1 + $0x2c] sm:$0xf0]  ;;  %v1203_v30 = vld [vmem:[%s1696_s1 + $0x14] sm:$0xf]  ;;  %v1053_v37 = vor.u32 %v1221_v36, %v1052_v35  ;;  %v1024_v38 = vld [vmem:[%s1696_s1 + $0x58] sm:$0xf] }
  0x18   :  { %1110 = vmatmul.msk.bf16.vlgmr.msra.gmra.mxu0 %vm242_vm0, %v1425_v4  ;;  %1111 = vmatmul.msk.bf16.vlgmr.msra.gmra.mxu1 %vm242_vm0, %v1425_v4  ;;  %v990_v31 = vld [vmem:[%s1696_s1 + $0x30] sm:$0xf0]  ;;  %v989_v32 = vor.u32 %v1206_v29, %v988_v28  ;;  %v1214_v39 = vld [vmem:[%s1696_s1 + $0x74] sm:$0xf0]  ;;  %v1246_v28 = vld [vmem:[%s1699_s4 + $0x5c] sm:$0xf0] }
  0x19   :  { %301 = vmatpush.bf16.msrb.mxu0 %v1101_v0  ;;  %314 = vmatpush.bf16.msrb.mxu1 %v1105_v1  ;;  %v993_v33 = vor.u32 %v1203_v30, %v990_v31  ;;  %v1025_v40 = vor.u32 %v1214_v39, %v1024_v38  ;;  %v996_v41 = vld [vmem:[%s1696_s1 + $0x18] sm:$0xf] }
  0x1a   :  { %1112 = vmatmul.msk.bf16.vlgmr.msra.gmra.mxu2 %vm242_vm0, %v1425_v4  ;;  %1113 = vmatmul.msk.bf16.vlgmr.msra.gmra.mxu3 %vm242_vm0, %v1425_v4  ;;  %v1207_v42 = vld [vmem:[%s1696_s1 + $0x34] sm:$0xf0] }
  0x1b   :  { %327 = vmatpush.bf16.msrb.mxu2 %v1109_v10  ;;  %516 = vmatpush.bf16.msrb.mxu3 %v1252_v20  ;;  %v997_v43 = vor.u32 %v1207_v42, %v996_v41  ;;  %v1133_v42 = vld [vmem:[%s1699_s4] sm:$0xf] }
  0x1d   :  { %302 = vmatpush.bf16.msrb.mxu0 %v1073_v9  ;;  %315 = vmatpush.bf16.msrb.mxu1 %v1077_v13 }
  0x1f   :  { %328 = vmatpush.bf16.msrb.mxu2 %v1081_v18 }
  0x21   :  { %303 = vmatpush.bf16.msrb.mxu0 %v1045_v19  ;;  %316 = vmatpush.bf16.msrb.mxu1 %v1049_v21 }
  0x23   :  { %329 = vmatpush.bf16.msrb.mxu2 %v1053_v37 }
  0x25   :  { %304 = vmatpush.bf16.msrb.mxu0 %v1017_v26  ;;  %317 = vmatpush.bf16.msrb.mxu1 %v1021_v27  ;;  %v1161_v27 = vld [vmem:[%s1699_s4 + $0x40] sm:$0xf] }
  0x26   :  { %v1162_v37 = vor.u32 %v1246_v28, %v1161_v27 }
  0x27   :  { %330 = vmatpush.bf16.msrb.mxu2 %v1025_v40 }
  0x29   :  { %305 = vmatpush.bf16.msrb.mxu0 %v989_v32  ;;  %318 = vmatpush.bf16.msrb.mxu1 %v993_v33 }
  0x2a   :  { %1124 = vmatmul.msk.bf16.vlgmr.msrb.gmra.mxu3 %vm483_vm1, %v1496_v34 }
  0x2b   :  { %331 = vmatpush.bf16.msrb.mxu2 %v997_v43  ;;  %v1239_v43 = vld [vmem:[%s1699_s4 + $0x1c] sm:$0xf0] }
  0x2c   :  { %1114 = vmatmul.msk.bf16.vlgmr.msrb.gmra.mxu0 %vm242_vm0, %v1425_v4  ;;  %1115 = vmatmul.msk.bf16.vlgmr.msrb.gmra.mxu1 %vm242_vm0, %v1425_v4 }
  0x2e   :  { %1116 = vmatmul.msk.bf16.vlgmr.msrb.gmra.mxu2 %vm242_vm0, %v1425_v4 }
  0x95   :  { %v255_v44 = vpop.f32.mrf.mxu0  ;;  %v268_v46 = vpop.f32.mrf.mxu1 }
  0x96   :  { %v337_v45 = vmul.f32 0.8243606, %v255_v44  ;;  %v344_v47 = vmul.f32 0.7357589, %v255_v44  ;;  %v338_v48 = vmul.f32 0.8243606, %v268_v46 }
  0x97   :  { %v345_v49 = vmul.f32 0.909796, %v268_v46  ;;  %v340_v52 = vmul.f32 0.909796, %v255_v44  ;;  %v359_v56 = vmul.f32 0.5578254, %v268_v46 }
  0x98   :  { %vm398_vm2 = vcmp.ge.f32.partialorder %v337_v45, 50.0  ;;  %v339_v54 = vadd.f32 %v338_v48, %v255_v44  ;;  %v358_v58 = vmul.f32 0.40600586, %v255_v44  ;;  %v351_v59 = vmul.f32 0.7357589, %v268_v46 }
  0x99   :  { %v1521_v51 = vsel %vm398_vm2, 1.0, %v1253_v50  ;;  %v346_v53 = vadd.f32 %v345_v49, %v344_v47  ;;  %v341_v62 = vadd.f32 %v340_v52, %v268_v46  ;;  %v350_v2 = vmul.f32 0.5578254, %v255_v44  ;;  %v1243_v52 = vld [vmem:[%s1699_s4 + $0x44] sm:$0xf] }
  0x9a   :  { %v402_v55 = vmul.f32 -41.218033, %v1521_v51  ;;  %v476_v57 = vpack.c.bf16 %v1521_v51, %v1521_v51  ;;  %v404_v10 = vmul.f32 -50.0, %v1521_v51  ;;  %v360_v11 = vadd.f32 %v359_v56, %v358_v58  ;;  %v1177_v56 = vld [vmem:[%s1699_s4 + $0x50] sm:$0xf] }
  0x9b   :  { %v406_v17 = vmul.f32 -45.4898, %v1521_v51  ;;  %v352_v18 = vadd.f32 %v351_v59, %v350_v2  ;;  %v408_v44 = vmul.f32 -36.787945, %v1521_v51  ;;  %v410_v49 = vmul.f32 -27.89127, %v1521_v51 }
  0x9c   :  { %v403_v60 = vadd.f32 %v402_v55, %v339_v54  ;;  %v492_v7 = vsel %vm487_vm3, %v476_v57, 0  ;;  %v1134_v55 = vor.u32 %v1239_v43, %v1133_v42  ;;  %v1248_v51 = vld [vmem:[%s1699_s4 + $0x6c] sm:$0xf0]  ;;  %v1135_v2 = vld [vmem:[%s1699_s4 + $0x20] sm:$0xf0] }
  0x9d   :  { %v281_v61 = vpop.f32.mrf.mxu2  ;;  %v294_v1 = vpop.f32.mrf.mxu3  ;;  %529 = vmatpush.bf16.msra.mxu3 %v492_v7 }
  0x9e   :  { %v342_v63 = vmul.f32 0.8243606, %v281_v61  ;;  %v347_v0 = vadd.f32 %v346_v53, %v281_v61  ;;  %v257_v3 = vpop.f32.mrf.mxu0  ;;  %vm414_vm4 = vcmp.ge.f32.partialorder %v403_v60, 50.0  ;;  %v361_v4 = vmul.f32 0.7357589, %v281_v61  ;;  %v270_v6 = vpop.f32.mrf.mxu1 }
  0x9f   :  { %v348_v5 = vmul.f32 0.8243606, %v294_v1  ;;  %v1118_v8 = vsel %vm414_vm4, 1.0, %v1253_v50  ;;  %v353_v12 = vmul.f32 0.909796, %v281_v61  ;;  %v1178_v60 = vor.u32 %v1248_v51, %v1177_v56 }
  0xa0   :  { %v343_v9 = vadd.f32 %v342_v63, %v341_v62  ;;  %v418_v13 = vmul.f32 -41.218033, %v1118_v8  ;;  %v477_v15 = vpack.c.bf16 %v1118_v8, %v1118_v8  ;;  %v363_v19 = vmul.f32 0.909796, %v294_v1  ;;  %1125 = vmatmul.msk.bf16.vlgmr.msra.gmra.mxu3 %vm483_vm1, %v1496_v34  ;;  %v1163_v53 = vld [vmem:[%s1699_s4 + $0x60] sm:$0xf0] }
  0xa1   :  { %v349_v14 = vadd.f32 %v348_v5, %v347_v0  ;;  %v362_v21 = vadd.f32 %v361_v4, %v360_v11  ;;  %v420_v24 = vmul.f32 -50.0, %v1118_v8  ;;  %v354_v25 = vadd.f32 %v353_v12, %v352_v18  ;;  %v1149_v5 = vld [vmem:[%s1699_s4 + $0x10] sm:$0xf]  ;;  %v1179_v11 = vld [vmem:[%s1699_s4 + $0x70] sm:$0xf0] }
  0xa2   :  { %v405_v16 = vadd.f32 %v404_v10, %v343_v9  ;;  %v495_v20 = vsel %vm487_vm3, %v477_v15, 0  ;;  %v422_v58 = vmul.f32 -45.4898, %v1118_v8  ;;  %v424_v62 = vmul.f32 -36.787945, %v1118_v8 }
  0xa3   :  { %v407_v23 = vadd.f32 %v406_v17, %v349_v14  ;;  %542 = vmatpush.bf16.msra.mxu0 %v495_v20  ;;  %v364_v31 = vadd.f32 %v363_v19, %v362_v21  ;;  %v355_v38 = vadd.f32 %v354_v25, %v294_v1  ;;  %v1166_v0 = vor.u32 %v1243_v52, %v1163_v53  ;;  %v1236_v1 = vld [vmem:[%s1699_s4 + $0x4] sm:$0xf]  ;;  %v1241_v6 = vld [vmem:[%s1699_s4 + $0x2c] sm:$0xf0]  ;;  %v1245_v10 = vld [vmem:[%s1699_s4 + $0x54] sm:$0xf] }
  0xa4   :  { %v419_v22 = vadd.f32 %v418_v13, %v405_v16  ;;  %v1150_v16 = vor.u32 %v1241_v6, %v1149_v5  ;;  %v1138_v17 = vor.u32 %v1236_v1, %v1135_v2  ;;  %v1169_v20 = vld [vmem:[%s1699_s4 + $0x48] sm:$0xf]  ;;  %v1143_v52 = vld [vmem:[%s1699_s4 + $0x28] sm:$0xf0] }
  0xa5   :  { %v283_v26 = vpop.f32.mrf.mxu2  ;;  %v296_v29 = vpop.f32.mrf.mxu3  ;;  %v421_v32 = vadd.f32 %v420_v24, %v407_v23  ;;  %v1247_v21 = vld [vmem:[%s1699_s4 + $0x64] sm:$0xf0]  ;;  %v1238_v23 = vld [vmem:[%s1699_s4 + $0x14] sm:$0xf] }
  0xa6   :  { %vm428_vm5 = vcmp.ge.f32.partialorder %v419_v22, 50.0  ;;  %1126 = vmatmul.msk.bf16.vlgmr.msra.gmra.mxu0 %vm483_vm1, %v1496_v34  ;;  %v1182_v22 = vor.u32 %v1245_v10, %v1179_v11  ;;  %v1151_v24 = vld [vmem:[%s1699_s4 + $0x30] sm:$0xf0]  ;;  %v1170_v27 = vor.u32 %v1247_v21, %v1169_v20 }
  0xa7   :  { %v1119_v30 = vsel %vm428_vm5, 1.0, %v1253_v50 }
  0xa8   :  { %v478_v35 = vpack.c.bf16 %v1119_v30, %v1119_v30  ;;  %v432_v36 = vmul.f32 -41.218033, %v1119_v30  ;;  %v434_v4 = vmul.f32 -50.0, %v1119_v30  ;;  %v436_v13 = vmul.f32 -45.4898, %v1119_v30 }
  0xa9   :  { %v307_v33 = vpop.f32.mrf.mxu0  ;;  %v320_v41 = vpop.f32.mrf.mxu1 }
  0xaa   :  { %v356_v39 = vmul.f32 0.8243606, %v307_v33  ;;  %v365_v40 = vadd.f32 %v364_v31, %v307_v33  ;;  %v366_v45 = vmul.f32 0.8243606, %v320_v41  ;;  %v498_v46 = vsel %vm487_vm3, %v478_v35, 0 }
  0xab   :  { %v433_v47 = vadd.f32 %v432_v36, %v421_v32  ;;  %555 = vmatpush.bf16.msra.mxu1 %v498_v46  ;;  %v1154_v31 = vor.u32 %v1238_v23, %v1151_v24  ;;  %v1141_v32 = vld [vmem:[%s1699_s4 + $0x8] sm:$0xf]  ;;  %v600_v41 = vld [vmem:[%s1700_s3] sm:$0xf] }
  0xac   :  { %v357_v48 = vadd.f32 %v356_v39, %v355_v38  ;;  %v367_v54 = vadd.f32 %v366_v45, %v365_v40  ;;  %v1240_v33 = vld [vmem:[%s1699_s4 + $0x24] sm:$0xf0]  ;;  %v1249_v38 = vld [vmem:[%s1699_s4 + $0x74] sm:$0xf0]  ;;  %v1244_v39 = vld [vmem:[%s1699_s4 + $0x4c] sm:$0xf] }
  0xad   :  { %vm440_vm6 = vcmp.ge.f32.partialorder %v433_v47, 50.0  ;;  %v1171_v40 = vld [vmem:[%s1699_s4 + $0x68] sm:$0xf0]  ;;  %v1142_v42 = vor.u32 %v1240_v33, %v1141_v32  ;;  %v1157_v47 = vld [vmem:[%s1699_s4 + $0x18] sm:$0xf]  ;;  %v518_v56 = vpop.f32.mrf.mxu3 }
  0xae   :  { %v409_v57 = vadd.f32 %v408_v44, %v357_v48  ;;  %v1120_v59 = vsel %vm440_vm6, 1.0, %v1253_v50  ;;  %v411_v61 = vadd.f32 %v410_v49, %v367_v54  ;;  %1127 = vmatmul.msk.bf16.vlgmr.msra.gmra.mxu1 %vm483_vm1, %v1496_v34  ;;  %v1174_v46 = vor.u32 %v1244_v39, %v1171_v40  ;;  %v1242_v48 = vld [vmem:[%s1699_s4 + $0x34] sm:$0xf0]  ;;  %v1237_v49 = vld [vmem:[%s1699_s4 + $0xc] sm:$0xf] }
  0xaf   :  { %699 = vmatpush.bf16.msrb.mxu1 %v1162_v37  ;;  %v479_v63 = vpack.c.bf16 %v1120_v59, %v1120_v59  ;;  %v444_v15 = vmul.f32 -41.218033, %v1120_v59  ;;  %v446_v25 = vmul.f32 -50.0, %v1120_v59  ;;  %v1185_v37 = vld [vmem:[%s1699_s4 + $0x58] sm:$0xf]  ;;  %v1158_v54 = vor.u32 %v1242_v48, %v1157_v47 }
  0xb0   :  { %v423_v3 = vadd.f32 %v422_v58, %v409_v57  ;;  %v425_v7 = vadd.f32 %v424_v62, %v411_v61  ;;  %v1186_v44 = vor.u32 %v1249_v38, %v1185_v37  ;;  %v853_v1 = vmul.f32 0.82664144, %v518_v56 }
  0xb1   :  { %v309_v8 = vpop.f32.mrf.mxu0  ;;  %v501_v9 = vsel %vm487_vm3, %v479_v63, 0  ;;  %v322_v14 = vpop.f32.mrf.mxu1  ;;  %v784_v5 = vmul.f32 0.52925, %v518_v56  ;;  %v786_v11 = vmul.f32 0.8243606, %v518_v56 }
  0xb2   :  { %v435_v12 = vadd.f32 %v434_v4, %v423_v3  ;;  %568 = vmatpush.bf16.msra.mxu2 %v501_v9  ;;  %v437_v18 = vadd.f32 %v436_v13, %v425_v7  ;;  %v333_v57 = vpop.f32.mrf.mxu2  ;;  %v832_v13 = vmul.f32 0.909796, %v518_v56  ;;  %v815_v14 = vmul.f32 0.97350097, %v518_v56 }
  0xb3   :  { %700 = vmatpush.bf16.msrb.mxu1 %v1134_v55  ;;  %v1146_v55 = vor.u32 %v1237_v49, %v1143_v52 }
  0xb4   :  { %v445_v19 = vadd.f32 %v444_v15, %v435_v12  ;;  %v447_v30 = vadd.f32 %v446_v25, %v437_v18 }
  0xb5   :  { %1128 = vmatmul.msk.bf16.vlgmr.msra.gmra.mxu2 %vm483_vm1, %v1496_v34  ;;  %v520_v51 = vpop.f32.mrf.mxu3 }
  0xb6   :  { %712 = vmatpush.bf16.msrb.mxu2 %v1166_v0  ;;  %vm450_vm7 = vcmp.ge.f32.partialorder %v445_v19, 50.0 }
  0xb7   :  { %751 = vmatpush.bf16.msra.mxu1 %v1178_v60  ;;  %v1121_v26 = vsel %vm450_vm7, 1.0, %v1253_v50 }
  0xb8   :  { %v454_v28 = vmul.f32 -41.218033, %v1121_v26  ;;  %v480_v29 = vpack.c.bf16 %v1121_v26, %v1121_v26 }
  0xba   :  { %713 = vmatpush.bf16.msrb.mxu2 %v1138_v17  ;;  %v504_v35 = vsel %vm487_vm3, %v480_v29, 0  ;;  %v455_v36 = vadd.f32 %v454_v28, %v447_v30  ;;  %v335_v58 = vpop.f32.mrf.mxu2 }
  0xbb   :  { %752 = vmatpush.bf16.msra.mxu1 %v1150_v16  ;;  %581 = vmatpush.bf16.msrb.mxu3 %v504_v35 }
  0xbc   :  { %vm458_vm9 = vcmp.ge.f32.partialorder %v455_v36, 50.0 }
  0xbd   :  { %v1122_v43 = vsel %vm458_vm9, 1.0, %v1253_v50 }
  0xbe   :  { %764 = vmatpush.bf16.msra.mxu2 %v1182_v22  ;;  %1129 = vmatmul.msk.bf16.vlgmr.msrb.gmra.mxu3 %vm483_vm1, %v1496_v34  ;;  %v481_v45 = vpack.c.bf16 %v1122_v43, %v1122_v43 }
  0xbf   :  { %725 = vmatpush.bf16.msra.mxu3 %v1170_v27  ;;  %1187 = vmatmul.msk.bf16.vlgmr.msrb.gmra.mxu1 %vm689_vm8, %v600_v41 }
  0xc0   :  { %v507_v53 = vsel %vm487_vm3, %v481_v45, 0 }
  0xc1   :  { %594 = vmatpush.bf16.msrb.mxu0 %v507_v53 }
  0xc2   :  { %765 = vmatpush.bf16.msra.mxu2 %v1154_v31  ;;  %v792_v31 = vmul.f32 0.9630191, %v518_v56 }
  0xc3   :  { %726 = vmatpush.bf16.msra.mxu3 %v1142_v42 }
  0xc4   :  { %1130 = vmatmul.msk.bf16.vlgmr.msrb.gmra.mxu0 %vm483_vm1, %v1496_v34 }
  0xc5   :  { %738 = vmatpush.bf16.msra.mxu0 %v1174_v46  ;;  %1188 = vmatmul.msk.bf16.vlgmr.msrb.gmra.mxu2 %vm689_vm8, %v600_v41 }
  0xc7   :  { %777 = vmatpush.bf16.msrb.mxu3 %v1186_v44 }
  0xc9   :  { %739 = vmatpush.bf16.msra.mxu0 %v1146_v55 }
  0xcb   :  { %778 = vmatpush.bf16.msrb.mxu3 %v1158_v54 }
  0xce   :  { %1189 = vmatmul.msk.bf16.vlgmr.msra.gmra.mxu3 %vm689_vm8, %v600_v41 }
  0xcf   :  { %1191 = vmatmul.msk.bf16.vlgmr.msra.gmra.mxu1 %vm689_vm8, %v600_v41 }
  0xd4   :  { %1190 = vmatmul.msk.bf16.vlgmr.msra.gmra.mxu0 %vm689_vm8, %v600_v41 }
  0xd5   :  { %1192 = vmatmul.msk.bf16.vlgmr.msra.gmra.mxu2 %vm689_vm8, %v600_v41 }
  0xde   :  { %1193 = vmatmul.msk.bf16.vlgmr.msrb.gmra.mxu3 %vm689_vm8, %v600_v41 }
 0x123   :  { %v544_v59 = vpop.f32.mrf.mxu0  ;;  %v531_v34 = vpop.f32.mrf.mxu3 }
 0x124   :  { %v854_v63 = vmul.f32 0.909796, %v531_v34  ;;  %v856_v2 = vmul.f32 0.97350097, %v544_v59  ;;  %v833_v9 = vmul.f32 0.97350097, %v531_v34  ;;  %v816_v28 = vadd.f32 %v815_v14, %v531_v34 }
 0x125   :  { %v802_v12 = vmul.f32 0.9630191, %v531_v34  ;;  %v787_v18 = vmul.f32 0.52925, %v531_v34  ;;  %v804_v19 = vmul.f32 0.8243606, %v544_v59 }
 0x126   :  { %v855_v4 = vadd.f32 %v854_v63, %v853_v1  ;;  %v793_v22 = vmul.f32 0.8243606, %v531_v34  ;;  %v834_v23 = vadd.f32 %v833_v9, %v832_v13  ;;  %v817_v27 = vmul.f32 0.9630191, %v544_v59 }
 0x127   :  { %v803_v26 = vadd.f32 %v802_v12, %v518_v56  ;;  %v788_v36 = vadd.f32 %v787_v18, %v786_v11  ;;  %v795_v38 = vmul.f32 0.52925, %v544_v59 }
 0x128   :  { %v857_v6 = vadd.f32 %v856_v2, %v855_v4  ;;  %v794_v40 = vadd.f32 %v793_v22, %v792_v31  ;;  %v835_v41 = vadd.f32 %v834_v23, %v544_v59  ;;  %v818_v44 = vadd.f32 %v817_v27, %v816_v28 }
 0x129   :  { %v805_v43 = vadd.f32 %v804_v19, %v803_v26 }
 0x12a   :  { %v796_v58 = vadd.f32 %v795_v38, %v794_v40 }
 0x12b   :  { %v557_v60 = vpop.f32.mrf.mxu1  ;;  %v546_v61 = vpop.f32.mrf.mxu0 }
 0x12c   :  { %v533_v62 = vpop.f32.mrf.mxu3  ;;  %v858_v15 = vadd.f32 %v857_v6, %v557_v60  ;;  %v836_v30 = vmul.f32 0.9630191, %v557_v60  ;;  %v819_v37 = vmul.f32 0.8243606, %v557_v60  ;;  %v806_v39 = vmul.f32 0.52925, %v557_v60 }
 0x12e   :  { %v837_v47 = vadd.f32 %v836_v30, %v835_v41  ;;  %v820_v54 = vadd.f32 %v819_v37, %v818_v44  ;;  %v807_v34 = vadd.f32 %v806_v39, %v805_v43 }
 0x133   :  { %v559_v0 = vpop.f32.mrf.mxu1 }
 0x138   :  { %v570_v3 = vpop.f32.mrf.mxu2 }
 0x139   :  { %v859_v10 = vmul.f32 0.9630191, %v570_v3  ;;  %v838_v42 = vmul.f32 0.8243606, %v570_v3  ;;  %v821_v45 = vmul.f32 0.52925, %v570_v3 }
 0x13b   :  { %v860_v24 = vadd.f32 %v859_v10, %v858_v15  ;;  %v839_v60 = vadd.f32 %v838_v42, %v837_v47  ;;  %v822_v61 = vadd.f32 %v821_v45, %v820_v54 }
 0x13c   :  { %v702_v7 = vpop.f32.mrf.mxu1 }
 0x13d   :  { %v785_v8 = vadd.f32 %v784_v5, %v702_v7  ;;  %v789_v29 = vmul.f32 0.7357589, %v702_v7  ;;  %v865_v52 = vmul.f32 0.017351266, %v702_v7  ;;  %v797_v59 = vmul.f32 0.40600586, %v702_v7 }
 0x13e   :  { %v808_v63 = vmul.f32 0.19914827, %v702_v7  ;;  %v823_v0 = vmul.f32 0.09157819, %v702_v7  ;;  %v842_v2 = vmul.f32 0.04042768, %v702_v7 }
 0x13f   :  { %vm896_vm10 = vcmp.ge.f32.partialorder %v785_v8, 100.0  ;;  %v790_v46 = vadd.f32 %v789_v29, %v788_v36  ;;  %v798_v11 = vadd.f32 %v797_v59, %v796_v58 }
 0x140   :  { %v1652_v16 = vsel %vm896_vm10, 1.0, %v1253_v50  ;;  %v572_v17 = vpop.f32.mrf.mxu2  ;;  %v809_v12 = vadd.f32 %v808_v63, %v807_v34  ;;  %v824_v13 = vadd.f32 %v823_v0, %v822_v61 }
 0x141   :  { %899 = vst [vmem:[%s1701_s5 + $0x8] sm:$0xff] %v1652_v16  ;;  %v583_v20 = vpop.f32.mrf.mxu3  ;;  %v596_v21 = vpop.f32.mrf.mxu0  ;;  %v900_v56 = vmul.f32 -52.925, %v1652_v16  ;;  %v902_v18 = vmul.f32 -82.436066, %v1652_v16 }
 0x142   :  { %v861_v25 = vmul.f32 0.8243606, %v583_v20  ;;  %v863_v33 = vmul.f32 0.52925, %v596_v21  ;;  %v840_v48 = vmul.f32 0.52925, %v583_v20 }
 0x143   :  { %v904_v44 = vmul.f32 -96.3019, %v1652_v16  ;;  %v908_v63 = vmul.f32 -97.3501, %v1652_v16 }
 0x144   :  { %v862_v32 = vadd.f32 %v861_v25, %v860_v24  ;;  %v704_v35 = vpop.f32.mrf.mxu1  ;;  %v841_v1 = vadd.f32 %v840_v48, %v839_v60  ;;  %v906_v48 = vmul.f32 -100.0, %v1652_v16 }
 0x146   :  { %v864_v49 = vadd.f32 %v863_v33, %v862_v32  ;;  %v843_v7 = vadd.f32 %v842_v2, %v841_v1 }
 0x148   :  { %v715_v53 = vpop.f32.mrf.mxu2  ;;  %v866_v3 = vadd.f32 %v865_v52, %v864_v49 }
 0x149   :  { %v791_v55 = vadd.f32 %v790_v46, %v715_v53  ;;  %v585_v51 = vpop.f32.mrf.mxu3  ;;  %v598_v57 = vpop.f32.mrf.mxu0  ;;  %v799_v4 = vmul.f32 0.7357589, %v715_v53  ;;  %v867_v6 = vmul.f32 0.04042768, %v715_v53  ;;  %v810_v8 = vmul.f32 0.40600586, %v715_v53 }
 0x14a   :  { %v825_v9 = vmul.f32 0.19914827, %v715_v53  ;;  %v844_v14 = vmul.f32 0.09157819, %v715_v53 }
 0x14b   :  { %v901_v62 = vadd.f32 %v900_v56, %v791_v55  ;;  %v800_v17 = vadd.f32 %v799_v4, %v798_v11  ;;  %v811_v22 = vadd.f32 %v810_v8, %v809_v12  ;;  %v868_v24 = vadd.f32 %v867_v6, %v866_v3 }
 0x14c   :  { %v754_v5 = vpop.f32.mrf.mxu1  ;;  %v826_v23 = vadd.f32 %v825_v9, %v824_v13  ;;  %v845_v32 = vadd.f32 %v844_v14, %v843_v7 }
 0x14d   :  { %vm912_vm11 = vcmp.ge.f32.partialorder %v901_v62, 100.0  ;;  %v850_v39 = vmul.f32 0.7357589, %v754_v5  ;;  %v873_v47 = vmul.f32 0.40600586, %v754_v5 }
 0x14e   :  { %v1660_v10 = vsel %vm912_vm11, 1.0, %v1253_v50 }
 0x14f   :  { %915 = vst [vmem:[%s1701_s5 + $0x10] sm:$0xff] %v1660_v10  ;;  %v916_v20 = vmul.f32 -52.925, %v1660_v10  ;;  %v918_v46 = vmul.f32 -82.436066, %v1660_v10 }
 0x150   :  { %v717_v15 = vpop.f32.mrf.mxu2  ;;  %v920_v61 = vmul.f32 -96.3019, %v1660_v10 }
 0x151   :  { %v728_v19 = vpop.f32.mrf.mxu3  ;;  %v741_v21 = vpop.f32.mrf.mxu0 }
 0x152   :  { %v801_v25 = vadd.f32 %v800_v17, %v728_v19  ;;  %v812_v26 = vmul.f32 0.7357589, %v728_v19  ;;  %v827_v27 = vmul.f32 0.40600586, %v728_v19  ;;  %v846_v28 = vmul.f32 0.19914827, %v728_v19 }
 0x153   :  { %v869_v29 = vmul.f32 0.09157819, %v728_v19  ;;  %v829_v30 = vmul.f32 0.7357589, %v741_v21  ;;  %v848_v31 = vmul.f32 0.40600586, %v741_v21 }
 0x154   :  { %v903_v33 = vadd.f32 %v902_v18, %v801_v25  ;;  %v813_v35 = vadd.f32 %v812_v26, %v811_v22  ;;  %v871_v36 = vmul.f32 0.19914827, %v741_v21  ;;  %v828_v37 = vadd.f32 %v827_v27, %v826_v23  ;;  %v756_v38 = vpop.f32.mrf.mxu1 }
 0x155   :  { %v847_v40 = vadd.f32 %v846_v28, %v845_v32  ;;  %v870_v41 = vadd.f32 %v869_v29, %v868_v24  ;;  %v910_v17 = vmul.f32 -90.9796, %v1652_v16  ;;  %v924_v23 = vmul.f32 -97.3501, %v1660_v10 }
 0x156   :  { %v917_v42 = vadd.f32 %v916_v20, %v903_v33  ;;  %v814_v43 = vadd.f32 %v813_v35, %v741_v21  ;;  %v830_v45 = vadd.f32 %v829_v30, %v828_v37 }
 0x157   :  { %v849_v49 = vadd.f32 %v848_v31, %v847_v40  ;;  %v872_v55 = vadd.f32 %v871_v36, %v870_v41 }
 0x158   :  { %vm926_vm12 = vcmp.ge.f32.partialorder %v917_v42, 100.0  ;;  %v905_v52 = vadd.f32 %v904_v44, %v814_v43  ;;  %v831_v53 = vadd.f32 %v830_v45, %v754_v5  ;;  %v767_v54 = vpop.f32.mrf.mxu2  ;;  %v922_v5 = vmul.f32 -100.0, %v1660_v10 }
 0x159   :  { %v1196_v56 = vsel %vm926_vm12, 1.0, %v1253_v50  ;;  %v851_v51 = vadd.f32 %v850_v39, %v849_v49  ;;  %v730_v57 = vpop.f32.mrf.mxu3  ;;  %v743_v58 = vpop.f32.mrf.mxu0  ;;  %v875_v2 = vmul.f32 0.7357589, %v767_v54  ;;  %v874_v3 = vadd.f32 %v873_v47, %v872_v55 }
 0x15a   :  { %929 = vst [vmem:[%s1701_s5 + $0x18] sm:$0xff] %v1196_v56  ;;  %v919_v34 = vadd.f32 %v918_v46, %v905_v52  ;;  %v930_v60 = vmul.f32 -52.925, %v1196_v56  ;;  %v907_v59 = vadd.f32 %v906_v48, %v831_v53  ;;  %v932_v6 = vmul.f32 -82.436066, %v1196_v56 }
 0x15b   :  { %v852_v62 = vadd.f32 %v851_v51, %v767_v54  ;;  %v934_v13 = vmul.f32 -96.3019, %v1196_v56  ;;  %v876_v14 = vadd.f32 %v875_v2, %v874_v3  ;;  %v936_v28 = vmul.f32 -100.0, %v1196_v56 }
 0x15c   :  { %v931_v0 = vadd.f32 %v930_v60, %v919_v34  ;;  %v921_v1 = vadd.f32 %v920_v61, %v907_v59 }
 0x15d   :  { %v909_v4 = vadd.f32 %v908_v63, %v852_v62 }
 0x15e   :  { %vm938_vm13 = vcmp.ge.f32.partialorder %v931_v0, 100.0  ;;  %v933_v11 = vadd.f32 %v932_v6, %v921_v1 }
 0x15f   :  { %v1197_v8 = vsel %vm938_vm13, 1.0, %v1253_v50  ;;  %v923_v9 = vadd.f32 %v922_v5, %v909_v4 }
 0x160   :  { %941 = vst [vmem:[%s1701_s5 + $0x20] sm:$0xff] %v1197_v8  ;;  %v942_v12 = vmul.f32 -52.925, %v1197_v8  ;;  %v769_v7 = vpop.f32.mrf.mxu2  ;;  %v944_v20 = vmul.f32 -82.436066, %v1197_v8 }
 0x161   :  { %v780_v15 = vpop.f32.mrf.mxu3  ;;  %v935_v19 = vadd.f32 %v934_v13, %v923_v9  ;;  %v946_v30 = vmul.f32 -96.3019, %v1197_v8 }
 0x162   :  { %v943_v18 = vadd.f32 %v942_v12, %v933_v11  ;;  %v877_v21 = vadd.f32 %v876_v14, %v780_v15 }
 0x163   :  { %v945_v25 = vadd.f32 %v944_v20, %v935_v19 }
 0x164   :  { %vm948_vm14 = vcmp.ge.f32.partialorder %v943_v18, 100.0  ;;  %v911_v22 = vadd.f32 %v910_v17, %v877_v21 }
 0x165   :  { %v1198_v24 = vsel %vm948_vm14, 1.0, %v1253_v50 }
 0x166   :  { %951 = vst [vmem:[%s1701_s5 + $0x28] sm:$0xff] %v1198_v24  ;;  %v952_v26 = vmul.f32 -52.925, %v1198_v24  ;;  %v925_v27 = vadd.f32 %v924_v23, %v911_v22  ;;  %v954_v33 = vmul.f32 -82.436066, %v1198_v24 }
 0x168   :  { %v953_v29 = vadd.f32 %v952_v26, %v945_v25  ;;  %v937_v16 = vadd.f32 %v936_v28, %v925_v27 }
 0x169   :  { %v782_v31 = vpop.f32.mrf.mxu3 }
 0x16a   :  { %vm956_vm15 = vcmp.ge.f32.partialorder %v953_v29, 100.0  ;;  %v947_v32 = vadd.f32 %v946_v30, %v937_v16 }
 0x16b   :  { %v1199_v35 = vsel %vm956_vm15, 1.0, %v1253_v50 }
 0x16c   :  { %959 = vst [vmem:[%s1701_s5 + $0x30] sm:$0xff] %v1199_v35  ;;  %v960_v10 = vmul.f32 -52.925, %v1199_v35  ;;  %v955_v36 = vadd.f32 %v954_v33, %v947_v32 }
 0x16e   :  { %v961_v37 = vadd.f32 %v960_v10, %v955_v36 }
 0x170   :  { %vm962_vm0 = vcmp.ge.f32.partialorder %v961_v37, 100.0 }
 0x171   :  { %v1200_v38 = vsel %vm962_vm0, 1.0, %v1253_v50 }
 0x172   :  { %965 = vst [vmem:[%s1701_s5 + $0x38] sm:$0xff] %v1200_v38 }

</bundles_post_ra>
